<compile_context>
chip_gen: v5e
topology: v5e:2x2
jax: 0.10.0
libtpu: 0.0.40
codegen_flags: <defaults>
</compile_context>

<pallas_src>
import functools

import jax
import jax.numpy as jnp
from jax import lax
from jax.experimental import pallas as pl
from jax.experimental.pallas import tpu as pltpu


# ---------------------------------------------------------------------------
# Fused forward kernel (whole model, one batch element per grid step)
# ---------------------------------------------------------------------------

def _layernorm(z, g, b, eps=1e-5):
    mu = jnp.mean(z, axis=-1, keepdims=True)
    var = jnp.mean((z - mu) * (z - mu), axis=-1, keepdims=True)
    return (z - mu) * lax.rsqrt(var + eps) * g + b


def _itransformer_kernel(
        x_ref, tok_ref, emb_w_ref, emb_b_ref,
        wqkv_ref, bqkv_ref, wo_ref, bo_ref,
        w1_ref, b1_ref, w2_ref, b2_ref,
        ln1_g_ref, ln1_b_ref, ln2_g_ref, ln2_b_ref,
        ng_ref, nb_ref, pw_ref, pb_ref,
        o_ref,
        *, n_heads, n_vars, activation):
    f32 = jnp.float32

    x = x_ref[0]          # [L, N]  raw series (for de-norm statistics)
    tok = tok_ref[0]      # [T, L]  raw tokens: first N rows = x_enc^T, rest = x_mark^T
    T, _L = tok.shape
    N = n_vars

    # ---- series normalization statistics ----
    # row-oriented stats ([1, N]) used for the final de-normalization
    mu_r = jnp.mean(x, axis=0, keepdims=True)
    var_r = jnp.mean((x - mu_r) * (x - mu_r), axis=0, keepdims=True)
    std_r = jnp.sqrt(var_r + 1e-5)            # biased variance, eps inside sqrt (matches torch)

    # column-oriented stats ([T, 1]); rows >= N are time-mark tokens -> left unnormalized
    mu_c = jnp.mean(tok, axis=1, keepdims=True)
    var_c = jnp.mean((tok - mu_c) * (tok - mu_c), axis=1, keepdims=True)
    is_var = lax.broadcasted_iota(jnp.int32, (T, 1), 0) < N
    tok_n = jnp.where(is_var, (tok - mu_c) * lax.rsqrt(var_c + 1e-5), tok)

    # ---- inverted embedding: [T, L] @ [L, D] + bias ----
    h = jnp.dot(tok_n, emb_w_ref[...], preferred_element_type=f32) + emb_b_ref[...]
    D = h.shape[-1]
    Dh = D // n_heads
    scale = 1.0 / (Dh ** 0.5)

    # ---- encoder layers ----
    n_layers = wqkv_ref.shape[0]
    for li in range(n_layers):
        wqkv = wqkv_ref[li]            # [D, 3D]
        bqkv = bqkv_ref[li]            # [1, 3D]
        wo = wo_ref[li]                # [D, D]
        bo = bo_ref[li]                # [1, D]

        qkv = jnp.dot(h, wqkv, preferred_element_type=f32) + bqkv   # [T, 3D]
        q = qkv[:, 0:D]
        k = qkv[:, D:2 * D]
        v = qkv[:, 2 * D:3 * D]

        # per-head attention, accumulated directly through the output projection
        new_x = jnp.zeros((T, D), f32)
        for hh in range(n_heads):
            sl = slice(hh * Dh, (hh + 1) * Dh)
            qh = q[:, sl]
            kh = k[:, sl]
            vh = v[:, sl]
            s = lax.dot_general(qh, kh, (((1,), (1,)), ((), ())),
                                preferred_element_type=f32) * scale   # [T, T]
            s = s - jnp.max(s, axis=-1, keepdims=True)
            p = jnp.exp(s)
            p = p * pl.reciprocal(jnp.sum(p, axis=-1, keepdims=True), approx=True)
            oh = jnp.dot(p, vh, preferred_element_type=f32)           # [T, Dh]
            new_x = new_x + jnp.dot(oh, wo[sl, :], preferred_element_type=f32)
        new_x = new_x + bo

        # norm1(x + attn)
        x1 = _layernorm(h + new_x, ln1_g_ref[li], ln1_b_ref[li])

        # FFN (Conv1d k=1 == dense): w1 + activation + w2, fully in-register
        y = jnp.dot(x1, w1_ref[li], preferred_element_type=f32) + b1_ref[li]
        if activation == "relu":
            y = jnp.maximum(y, 0.0)
        else:
            # TODO(synk): PyTorch F.gelu defaults to exact erf GELU; tanh approximation used.
            y = jax.nn.gelu(y, approximate=True)
        y = jnp.dot(y, w2_ref[li], preferred_element_type=f32) + b2_ref[li]

        # norm2(x + y)
        h = _layernorm(x1 + y, ln2_g_ref[li], ln2_b_ref[li])

    # ---- encoder final LayerNorm (dedicated, no zeros-add) ----
    h = _layernorm(h, ng_ref[...], nb_ref[...])

    # ---- projector, emitted directly in [P, N] layout, then de-normalize ----
    h_var = h[0:N, :]                                                  # [N, D]
    dec = lax.dot_general(pw_ref[...], h_var, (((1,), (1,)), ((), ())),
                          preferred_element_type=f32) + pb_ref[...]    # [P, N]
    o_ref[0] = dec * std_r + mu_r


# ---------------------------------------------------------------------------
# Parameter init (weights stored in kernel-friendly, fused/stacked layouts)
# ---------------------------------------------------------------------------

def init_params(key, cfg):
    L, D, F, P, E = (cfg["seq_len"], cfg["d_model"], cfg["d_ff"],
                     cfg["pred_len"], cfg["e_layers"])

    def dense(k, fan_in, fan_out):
        kw, kb = jax.random.split(k)
        bound = 1.0 / (fan_in ** 0.5)
        # stored as [in, out] (transpose of torch nn.Linear weight)
        w = jax.random.uniform(kw, (fan_in, fan_out), jnp.float32, -bound, bound)
        b = jax.random.uniform(kb, (1, fan_out), jnp.float32, -bound, bound)
        return w, b

    keys = jax.random.split(key, 2 + E)
    params = {}
    params["emb_w"], params["emb_b"] = dense(keys[0], L, D)   # DataEmbedding_inverted
    pw, pb = dense(keys[1], D, P)                             # projector
    params["proj_wT"] = pw.T                                  # [P, D]
    params["proj_bT"] = pb.T                                  # [P, 1]
    params["norm_g"] = jnp.ones((1, D), jnp.float32)          # encoder final LayerNorm
    params["norm_b"] = jnp.zeros((1, D), jnp.float32)

    wqkv, bqkv, wo, bo, w1, b1, w2, b2 = [], [], [], [], [], [], [], []
    ln1g, ln1b, ln2g, ln2b = [], [], [], []
    for li in range(E):
        lk = jax.random.split(keys[2 + li], 6)
        wq, bq = dense(lk[0], D, D)
        wk, bk = dense(lk[1], D, D)
        wv, bv = dense(lk[2], D, D)
        wqkv.append(jnp.concatenate([wq, wk, wv], axis=1))    # fused QKV [D, 3D]
        bqkv.append(jnp.concatenate([bq, bk, bv], axis=1))    # [1, 3D]
        w, b = dense(lk[3], D, D); wo.append(w); bo.append(b)
        w, b = dense(lk[4], D, F); w1.append(w); b1.append(b)   # Conv1d(d_model, d_ff, 1)
        w, b = dense(lk[5], F, D); w2.append(w); b2.append(b)   # Conv1d(d_ff, d_model, 1)
        ln1g.append(jnp.ones((1, D), jnp.float32)); ln1b.append(jnp.zeros((1, D), jnp.float32))
        ln2g.append(jnp.ones((1, D), jnp.float32)); ln2b.append(jnp.zeros((1, D), jnp.float32))

    stack = lambda xs: jnp.stack(xs, axis=0)
    params["wqkv"], params["bqkv"] = stack(wqkv), stack(bqkv)
    params["wo"], params["bo"] = stack(wo), stack(bo)
    params["w1"], params["b1"] = stack(w1), stack(b1)
    params["w2"], params["b2"] = stack(w2), stack(b2)
    params["ln1_g"], params["ln1_b"] = stack(ln1g), stack(ln1b)
    params["ln2_g"], params["ln2_b"] = stack(ln2g), stack(ln2b)
    return params


# ---------------------------------------------------------------------------
# Forward wrapper: one fused pallas_call, grid over batch
# ---------------------------------------------------------------------------

def itransformer_forward(params, x_enc, x_mark_enc, cfg):
    B, L, N = x_enc.shape
    M = x_mark_enc.shape[2]
    T = N + M
    H, P = cfg["n_heads"], cfg["pred_len"]

    # Raw token matrix [B, T, L]: variates then time-mark channels (normalization
    # of the variate rows happens inside the kernel).  Two cheap XLA ops, done once.
    tokens = jnp.concatenate(
        [jnp.transpose(x_enc, (0, 2, 1)), jnp.transpose(x_mark_enc, (0, 2, 1))],
        axis=1)

    def batch_spec(shape):
        nd = len(shape)
        return pl.BlockSpec((1,) + tuple(shape[1:]), lambda b: (b,) + (0,) * (nd - 1))

    def full_spec(shape):
        nd = len(shape)
        return pl.BlockSpec(tuple(shape), lambda b: (0,) * nd)

    kernel = functools.partial(_itransformer_kernel, n_heads=H, n_vars=N,
                               activation=cfg["activation"])

    in_arrays = (x_enc, tokens,
                 params["emb_w"], params["emb_b"],
                 params["wqkv"], params["bqkv"], params["wo"], params["bo"],
                 params["w1"], params["b1"], params["w2"], params["b2"],
                 params["ln1_g"], params["ln1_b"], params["ln2_g"], params["ln2_b"],
                 params["norm_g"], params["norm_b"],
                 params["proj_wT"], params["proj_bT"])

    in_specs = ([batch_spec(x_enc.shape), batch_spec(tokens.shape)]
                + [full_spec(a.shape) for a in in_arrays[2:]])

    out = pl.pallas_call(
        kernel,
        out_shape=jax.ShapeDtypeStruct((B, P, N), jnp.float32),
        grid=(B,),
        in_specs=in_specs,
        out_specs=batch_spec((B, P, N)),
        compiler_params=pltpu.CompilerParams(dimension_semantics=("parallel",)),
    )(*in_arrays)
    return out  # == dec_out[:, -pred_len:, :]


# ---------------------------------------------------------------------------
# Main
# ---------------------------------------------------------------------------

if __name__ == "__main__":
    cfg = dict(seq_len=16, pred_len=8, d_model=32, n_heads=4, d_ff=64,
               e_layers=2, activation="gelu", use_norm=True)
    B, N, M = 2, 4, 3  # batch, variates, time-feature channels

    key = jax.random.PRNGKey(0)
    kx, km, kp = jax.random.split(key, 3)
    x_enc = jax.random.normal(kx, (B, cfg["seq_len"], N), jnp.float32)
    x_mark_enc = jax.random.normal(km, (B, cfg["seq_len"], M), jnp.float32)

    params = init_params(kp, cfg)
    out = itransformer_forward(params, x_enc, x_mark_enc, cfg)
    out = jax.block_until_ready(out)
    assert out.shape == (B, cfg["pred_len"], N), out.shape
    assert bool(jnp.all(jnp.isfinite(out)))
    print("KERNEL_OK")
</pallas_src>

<mosaic_0001>
module attributes {stable_mosaic.version = 11 : i64} {
  func.func @_itransformer_kernel(%arg0: i32, %arg1: memref<1x16x4xf32, #tpu.memory_space<vmem>>, %arg2: memref<1x7x16xf32, #tpu.memory_space<vmem>>, %arg3: memref<16x32xf32, #tpu.memory_space<vmem>>, %arg4: memref<1x32xf32, #tpu.memory_space<vmem>>, %arg5: memref<2x32x96xf32, #tpu.memory_space<vmem>>, %arg6: memref<2x1x96xf32, #tpu.memory_space<vmem>>, %arg7: memref<2x32x32xf32, #tpu.memory_space<vmem>>, %arg8: memref<2x1x32xf32, #tpu.memory_space<vmem>>, %arg9: memref<2x32x64xf32, #tpu.memory_space<vmem>>, %arg10: memref<2x1x64xf32, #tpu.memory_space<vmem>>, %arg11: memref<2x64x32xf32, #tpu.memory_space<vmem>>, %arg12: memref<2x1x32xf32, #tpu.memory_space<vmem>>, %arg13: memref<2x1x32xf32, #tpu.memory_space<vmem>>, %arg14: memref<2x1x32xf32, #tpu.memory_space<vmem>>, %arg15: memref<2x1x32xf32, #tpu.memory_space<vmem>>, %arg16: memref<2x1x32xf32, #tpu.memory_space<vmem>>, %arg17: memref<1x32xf32, #tpu.memory_space<vmem>>, %arg18: memref<1x32xf32, #tpu.memory_space<vmem>>, %arg19: memref<8x32xf32, #tpu.memory_space<vmem>>, %arg20: memref<8x1xf32, #tpu.memory_space<vmem>>, %arg21: memref<1x8x4xf32, #tpu.memory_space<vmem>>) attributes {dimension_semantics = [#tpu.dimension_semantics<parallel>], iteration_bounds = array<i64: 2>, scalar_prefetch = 0 : i64, scratch_operands = 0 : i64, tpu.core_type = #tpu.core_type<tc>, window_params = [{transform_indices = @transform_0, window_bounds = array<i64: 1, 16, 4>}, {transform_indices = @transform_1, window_bounds = array<i64: 1, 7, 16>}, {pipeline_mode = #tpu.pipeline_mode<synchronous>, transform_indices = @transform_2, window_bounds = array<i64: 16, 32>}, {pipeline_mode = #tpu.pipeline_mode<synchronous>, transform_indices = @transform_3, window_bounds = array<i64: 1, 32>}, {pipeline_mode = #tpu.pipeline_mode<synchronous>, transform_indices = @transform_4, window_bounds = array<i64: 2, 32, 96>}, {pipeline_mode = #tpu.pipeline_mode<synchronous>, transform_indices = @transform_5, window_bounds = array<i64: 2, 1, 96>}, {pipeline_mode = #tpu.pipeline_mode<synchronous>, transform_indices = @transform_6, window_bounds = array<i64: 2, 32, 32>}, {pipeline_mode = #tpu.pipeline_mode<synchronous>, transform_indices = @transform_7, window_bounds = array<i64: 2, 1, 32>}, {pipeline_mode = #tpu.pipeline_mode<synchronous>, transform_indices = @transform_8, window_bounds = array<i64: 2, 32, 64>}, {pipeline_mode = #tpu.pipeline_mode<synchronous>, transform_indices = @transform_9, window_bounds = array<i64: 2, 1, 64>}, {pipeline_mode = #tpu.pipeline_mode<synchronous>, transform_indices = @transform_10, window_bounds = array<i64: 2, 64, 32>}, {pipeline_mode = #tpu.pipeline_mode<synchronous>, transform_indices = @transform_11, window_bounds = array<i64: 2, 1, 32>}, {pipeline_mode = #tpu.pipeline_mode<synchronous>, transform_indices = @transform_12, window_bounds = array<i64: 2, 1, 32>}, {pipeline_mode = #tpu.pipeline_mode<synchronous>, transform_indices = @transform_13, window_bounds = array<i64: 2, 1, 32>}, {pipeline_mode = #tpu.pipeline_mode<synchronous>, transform_indices = @transform_14, window_bounds = array<i64: 2, 1, 32>}, {pipeline_mode = #tpu.pipeline_mode<synchronous>, transform_indices = @transform_15, window_bounds = array<i64: 2, 1, 32>}, {pipeline_mode = #tpu.pipeline_mode<synchronous>, transform_indices = @transform_16, window_bounds = array<i64: 1, 32>}, {pipeline_mode = #tpu.pipeline_mode<synchronous>, transform_indices = @transform_17, window_bounds = array<i64: 1, 32>}, {pipeline_mode = #tpu.pipeline_mode<synchronous>, transform_indices = @transform_18, window_bounds = array<i64: 8, 32>}, {pipeline_mode = #tpu.pipeline_mode<synchronous>, transform_indices = @transform_19, window_bounds = array<i64: 8, 1>}, {transform_indices = @transform_20, window_bounds = array<i64: 1, 8, 4>}]} {
    %c0 = arith.constant 0 : index
    %c0_0 = arith.constant 0 : index
    %c0_1 = arith.constant 0 : index
    %0 = vector.load %arg1[%c0, %c0_0, %c0_1] : memref<1x16x4xf32, #tpu.memory_space<vmem>>, vector<1x16x4xf32>
    %1 = vector.shape_cast %0 : vector<1x16x4xf32> to vector<16x4xf32>
    %c0_2 = arith.constant 0 : index
    %c0_3 = arith.constant 0 : index
    %c0_4 = arith.constant 0 : index
    %2 = vector.load %arg2[%c0_2, %c0_3, %c0_4] : memref<1x7x16xf32, #tpu.memory_space<vmem>>, vector<1x7x16xf32>
    %3 = vector.shape_cast %2 : vector<1x7x16xf32> to vector<7x16xf32>
    %cst = arith.constant dense<0.000000e+00> : vector<4xf32>
    %4 = vector.multi_reduction <add>, %1, %cst [0] : vector<16x4xf32> to vector<4xf32>
    %5 = vector.shape_cast %4 : vector<4xf32> to vector<1x4xf32>
    %cst_5 = arith.constant 1.600000e+01 : f32
    %6 = vector.broadcast %cst_5 : f32 to vector<1x4xf32>
    %7 = arith.divf %5, %6 : vector<1x4xf32>
    %8 = vector.broadcast %7 : vector<1x4xf32> to vector<16x4xf32>
    %9 = arith.subf %1, %8 : vector<16x4xf32>
    %10 = vector.broadcast %7 : vector<1x4xf32> to vector<16x4xf32>
    %11 = arith.subf %1, %10 : vector<16x4xf32>
    %12 = arith.mulf %9, %11 : vector<16x4xf32>
    %cst_6 = arith.constant dense<0.000000e+00> : vector<4xf32>
    %13 = vector.multi_reduction <add>, %12, %cst_6 [0] : vector<16x4xf32> to vector<4xf32>
    %14 = vector.shape_cast %13 : vector<4xf32> to vector<1x4xf32>
    %cst_7 = arith.constant 1.600000e+01 : f32
    %15 = vector.broadcast %cst_7 : f32 to vector<1x4xf32>
    %16 = arith.divf %14, %15 : vector<1x4xf32>
    %cst_8 = arith.constant 9.99999974E-6 : f32
    %17 = vector.broadcast %cst_8 : f32 to vector<1x4xf32>
    %18 = arith.addf %16, %17 : vector<1x4xf32>
    %19 = math.sqrt %18 : vector<1x4xf32>
    %cst_9 = arith.constant dense<0.000000e+00> : vector<7xf32>
    %20 = vector.multi_reduction <add>, %3, %cst_9 [1] : vector<7x16xf32> to vector<7xf32>
    %21 = vector.shape_cast %20 : vector<7xf32> to vector<7x1xf32>
    %cst_10 = arith.constant 1.600000e+01 : f32
    %22 = vector.broadcast %cst_10 : f32 to vector<7x1xf32>
    %23 = arith.divf %21, %22 : vector<7x1xf32>
    %24 = vector.broadcast %23 : vector<7x1xf32> to vector<7x16xf32>
    %25 = arith.subf %3, %24 : vector<7x16xf32>
    %26 = vector.broadcast %23 : vector<7x1xf32> to vector<7x16xf32>
    %27 = arith.subf %3, %26 : vector<7x16xf32>
    %28 = arith.mulf %25, %27 : vector<7x16xf32>
    %cst_11 = arith.constant dense<0.000000e+00> : vector<7xf32>
    %29 = vector.multi_reduction <add>, %28, %cst_11 [1] : vector<7x16xf32> to vector<7xf32>
    %30 = vector.shape_cast %29 : vector<7xf32> to vector<7x1xf32>
    %cst_12 = arith.constant 1.600000e+01 : f32
    %31 = vector.broadcast %cst_12 : f32 to vector<7x1xf32>
    %32 = arith.divf %30, %31 : vector<7x1xf32>
    %33 = tpu.iota {dimensions = array<i32: 0>} : vector<7x1xi32>
    %c4_i32 = arith.constant 4 : i32
    %34 = vector.broadcast %c4_i32 : i32 to vector<7x1xi32>
    %35 = arith.cmpi slt, %33, %34 : vector<7x1xi32>
    %36 = vector.broadcast %23 : vector<7x1xf32> to vector<7x16xf32>
    %37 = arith.subf %3, %36 : vector<7x16xf32>
    %cst_13 = arith.constant 9.99999974E-6 : f32
    %38 = vector.broadcast %cst_13 : f32 to vector<7x1xf32>
    %39 = arith.addf %32, %38 : vector<7x1xf32>
    %40 = math.rsqrt %39 : vector<7x1xf32>
    %41 = vector.broadcast %40 : vector<7x1xf32> to vector<7x16xf32>
    %42 = arith.mulf %37, %41 : vector<7x16xf32>
    %43 = vector.shape_cast %35 : vector<7x1xi1> to vector<7x1xi1>
    %44 = vector.broadcast %43 : vector<7x1xi1> to vector<7x16xi1>
    %45 = arith.select %44, %42, %3 : vector<7x16xi1>, vector<7x16xf32>
    %c0_14 = arith.constant 0 : index
    %c0_15 = arith.constant 0 : index
    %46 = vector.load %arg3[%c0_14, %c0_15] : memref<16x32xf32, #tpu.memory_space<vmem>>, vector<16x32xf32>
    %cst_16 = arith.constant dense<0.000000e+00> : vector<7x32xf32>
    %47 = tpu.matmul %45, %46, %cst_16 {dimension_numbers = #tpu.dot_dimension_numbers<[1], [0], [0], [1], [0, 0, 1, 1], [], []>} : vector<7x16xf32>, vector<16x32xf32>, vector<7x32xf32> -> vector<7x32xf32>
    %c0_17 = arith.constant 0 : index
    %c0_18 = arith.constant 0 : index
    %48 = vector.load %arg4[%c0_17, %c0_18] : memref<1x32xf32, #tpu.memory_space<vmem>>, vector<1x32xf32>
    %49 = vector.broadcast %48 : vector<1x32xf32> to vector<7x32xf32>
    %50 = arith.addf %47, %49 : vector<7x32xf32>
    %c0_19 = arith.constant 0 : index
    %c0_20 = arith.constant 0 : index
    %c0_21 = arith.constant 0 : index
    %51 = vector.load %arg5[%c0_19, %c0_20, %c0_21] : memref<2x32x96xf32, #tpu.memory_space<vmem>>, vector<1x32x96xf32>
    %52 = vector.shape_cast %51 : vector<1x32x96xf32> to vector<32x96xf32>
    %c0_22 = arith.constant 0 : index
    %c0_23 = arith.constant 0 : index
    %c0_24 = arith.constant 0 : index
    %53 = vector.load %arg6[%c0_22, %c0_23, %c0_24] : memref<2x1x96xf32, #tpu.memory_space<vmem>>, vector<1x1x96xf32>
    %54 = vector.shape_cast %53 : vector<1x1x96xf32> to vector<1x96xf32>
    %c0_25 = arith.constant 0 : index
    %c0_26 = arith.constant 0 : index
    %c0_27 = arith.constant 0 : index
    %55 = vector.load %arg7[%c0_25, %c0_26, %c0_27] : memref<2x32x32xf32, #tpu.memory_space<vmem>>, vector<1x32x32xf32>
    %56 = vector.shape_cast %55 : vector<1x32x32xf32> to vector<32x32xf32>
    %c0_28 = arith.constant 0 : index
    %c0_29 = arith.constant 0 : index
    %c0_30 = arith.constant 0 : index
    %57 = vector.load %arg8[%c0_28, %c0_29, %c0_30] : memref<2x1x32xf32, #tpu.memory_space<vmem>>, vector<1x1x32xf32>
    %58 = vector.shape_cast %57 : vector<1x1x32xf32> to vector<1x32xf32>
    %cst_31 = arith.constant dense<0.000000e+00> : vector<7x96xf32>
    %59 = tpu.matmul %50, %52, %cst_31 {dimension_numbers = #tpu.dot_dimension_numbers<[1], [0], [0], [1], [0, 0, 1, 1], [], []>} : vector<7x32xf32>, vector<32x96xf32>, vector<7x96xf32> -> vector<7x96xf32>
    %60 = vector.broadcast %54 : vector<1x96xf32> to vector<7x96xf32>
    %61 = arith.addf %59, %60 : vector<7x96xf32>
    %62 = vector.extract_strided_slice %61 {offsets = [0, 0], sizes = [7, 32], strides = [1, 1]} : vector<7x96xf32> to vector<7x32xf32>
    %63 = vector.extract_strided_slice %61 {offsets = [0, 32], sizes = [7, 32], strides = [1, 1]} : vector<7x96xf32> to vector<7x32xf32>
    %64 = vector.extract_strided_slice %61 {offsets = [0, 64], sizes = [7, 32], strides = [1, 1]} : vector<7x96xf32> to vector<7x32xf32>
    %cst_32 = arith.constant 0.000000e+00 : f32
    %65 = vector.broadcast %cst_32 : f32 to vector<7x32xf32>
    %66 = vector.extract_strided_slice %62 {offsets = [0, 0], sizes = [7, 8], strides = [1, 1]} : vector<7x32xf32> to vector<7x8xf32>
    %67 = vector.extract_strided_slice %63 {offsets = [0, 0], sizes = [7, 8], strides = [1, 1]} : vector<7x32xf32> to vector<7x8xf32>
    %68 = vector.extract_strided_slice %64 {offsets = [0, 0], sizes = [7, 8], strides = [1, 1]} : vector<7x32xf32> to vector<7x8xf32>
    %cst_33 = arith.constant dense<0.000000e+00> : vector<7x7xf32>
    %69 = tpu.matmul %66, %67, %cst_33 {dimension_numbers = #tpu.dot_dimension_numbers<[1], [1], [0], [0], [0, 0, 1, 0], [], []>} : vector<7x8xf32>, vector<7x8xf32>, vector<7x7xf32> -> vector<7x7xf32>
    %cst_34 = arith.constant 0.353553385 : f32
    %70 = vector.broadcast %cst_34 : f32 to vector<7x7xf32>
    %71 = arith.mulf %69, %70 : vector<7x7xf32>
    %cst_35 = arith.constant dense<0xFF800000> : vector<7xf32>
    %72 = vector.multi_reduction <maximumf>, %71, %cst_35 [1] : vector<7x7xf32> to vector<7xf32>
    %73 = vector.shape_cast %72 : vector<7xf32> to vector<7x1xf32>
    %74 = vector.broadcast %73 : vector<7x1xf32> to vector<7x7xf32>
    %75 = arith.subf %71, %74 : vector<7x7xf32>
    %76 = math.exp %75 : vector<7x7xf32>
    %cst_36 = arith.constant dense<0.000000e+00> : vector<7xf32>
    %77 = vector.multi_reduction <add>, %76, %cst_36 [1] : vector<7x7xf32> to vector<7xf32>
    %78 = vector.shape_cast %77 : vector<7xf32> to vector<7x1xf32>
    %79 = tpu.reciprocal %78 {approx = true} : vector<7x1xf32> -> vector<7x1xf32>
    %80 = vector.broadcast %79 : vector<7x1xf32> to vector<7x7xf32>
    %81 = arith.mulf %76, %80 : vector<7x7xf32>
    %cst_37 = arith.constant dense<0.000000e+00> : vector<7x8xf32>
    %82 = tpu.matmul %81, %68, %cst_37 {dimension_numbers = #tpu.dot_dimension_numbers<[1], [0], [0], [1], [0, 0, 1, 1], [], []>} : vector<7x7xf32>, vector<7x8xf32>, vector<7x8xf32> -> vector<7x8xf32>
    %83 = vector.extract_strided_slice %56 {offsets = [0, 0], sizes = [8, 32], strides = [1, 1]} : vector<32x32xf32> to vector<8x32xf32>
    %cst_38 = arith.constant dense<0.000000e+00> : vector<7x32xf32>
    %84 = tpu.matmul %82, %83, %cst_38 {dimension_numbers = #tpu.dot_dimension_numbers<[1], [0], [0], [1], [0, 0, 1, 1], [], []>} : vector<7x8xf32>, vector<8x32xf32>, vector<7x32xf32> -> vector<7x32xf32>
    %85 = arith.addf %65, %84 : vector<7x32xf32>
    %86 = vector.extract_strided_slice %62 {offsets = [0, 8], sizes = [7, 8], strides = [1, 1]} : vector<7x32xf32> to vector<7x8xf32>
    %87 = vector.extract_strided_slice %63 {offsets = [0, 8], sizes = [7, 8], strides = [1, 1]} : vector<7x32xf32> to vector<7x8xf32>
    %88 = vector.extract_strided_slice %64 {offsets = [0, 8], sizes = [7, 8], strides = [1, 1]} : vector<7x32xf32> to vector<7x8xf32>
    %cst_39 = arith.constant dense<0.000000e+00> : vector<7x7xf32>
    %89 = tpu.matmul %86, %87, %cst_39 {dimension_numbers = #tpu.dot_dimension_numbers<[1], [1], [0], [0], [0, 0, 1, 0], [], []>} : vector<7x8xf32>, vector<7x8xf32>, vector<7x7xf32> -> vector<7x7xf32>
    %cst_40 = arith.constant 0.353553385 : f32
    %90 = vector.broadcast %cst_40 : f32 to vector<7x7xf32>
    %91 = arith.mulf %89, %90 : vector<7x7xf32>
    %cst_41 = arith.constant dense<0xFF800000> : vector<7xf32>
    %92 = vector.multi_reduction <maximumf>, %91, %cst_41 [1] : vector<7x7xf32> to vector<7xf32>
    %93 = vector.shape_cast %92 : vector<7xf32> to vector<7x1xf32>
    %94 = vector.broadcast %93 : vector<7x1xf32> to vector<7x7xf32>
    %95 = arith.subf %91, %94 : vector<7x7xf32>
    %96 = math.exp %95 : vector<7x7xf32>
    %cst_42 = arith.constant dense<0.000000e+00> : vector<7xf32>
    %97 = vector.multi_reduction <add>, %96, %cst_42 [1] : vector<7x7xf32> to vector<7xf32>
    %98 = vector.shape_cast %97 : vector<7xf32> to vector<7x1xf32>
    %99 = tpu.reciprocal %98 {approx = true} : vector<7x1xf32> -> vector<7x1xf32>
    %100 = vector.broadcast %99 : vector<7x1xf32> to vector<7x7xf32>
    %101 = arith.mulf %96, %100 : vector<7x7xf32>
    %cst_43 = arith.constant dense<0.000000e+00> : vector<7x8xf32>
    %102 = tpu.matmul %101, %88, %cst_43 {dimension_numbers = #tpu.dot_dimension_numbers<[1], [0], [0], [1], [0, 0, 1, 1], [], []>} : vector<7x7xf32>, vector<7x8xf32>, vector<7x8xf32> -> vector<7x8xf32>
    %103 = vector.extract_strided_slice %56 {offsets = [8, 0], sizes = [8, 32], strides = [1, 1]} : vector<32x32xf32> to vector<8x32xf32>
    %cst_44 = arith.constant dense<0.000000e+00> : vector<7x32xf32>
    %104 = tpu.matmul %102, %103, %cst_44 {dimension_numbers = #tpu.dot_dimension_numbers<[1], [0], [0], [1], [0, 0, 1, 1], [], []>} : vector<7x8xf32>, vector<8x32xf32>, vector<7x32xf32> -> vector<7x32xf32>
    %105 = arith.addf %85, %104 : vector<7x32xf32>
    %106 = vector.extract_strided_slice %62 {offsets = [0, 16], sizes = [7, 8], strides = [1, 1]} : vector<7x32xf32> to vector<7x8xf32>
    %107 = vector.extract_strided_slice %63 {offsets = [0, 16], sizes = [7, 8], strides = [1, 1]} : vector<7x32xf32> to vector<7x8xf32>
    %108 = vector.extract_strided_slice %64 {offsets = [0, 16], sizes = [7, 8], strides = [1, 1]} : vector<7x32xf32> to vector<7x8xf32>
    %cst_45 = arith.constant dense<0.000000e+00> : vector<7x7xf32>
    %109 = tpu.matmul %106, %107, %cst_45 {dimension_numbers = #tpu.dot_dimension_numbers<[1], [1], [0], [0], [0, 0, 1, 0], [], []>} : vector<7x8xf32>, vector<7x8xf32>, vector<7x7xf32> -> vector<7x7xf32>
    %cst_46 = arith.constant 0.353553385 : f32
    %110 = vector.broadcast %cst_46 : f32 to vector<7x7xf32>
    %111 = arith.mulf %109, %110 : vector<7x7xf32>
    %cst_47 = arith.constant dense<0xFF800000> : vector<7xf32>
    %112 = vector.multi_reduction <maximumf>, %111, %cst_47 [1] : vector<7x7xf32> to vector<7xf32>
    %113 = vector.shape_cast %112 : vector<7xf32> to vector<7x1xf32>
    %114 = vector.broadcast %113 : vector<7x1xf32> to vector<7x7xf32>
    %115 = arith.subf %111, %114 : vector<7x7xf32>
    %116 = math.exp %115 : vector<7x7xf32>
    %cst_48 = arith.constant dense<0.000000e+00> : vector<7xf32>
    %117 = vector.multi_reduction <add>, %116, %cst_48 [1] : vector<7x7xf32> to vector<7xf32>
    %118 = vector.shape_cast %117 : vector<7xf32> to vector<7x1xf32>
    %119 = tpu.reciprocal %118 {approx = true} : vector<7x1xf32> -> vector<7x1xf32>
    %120 = vector.broadcast %119 : vector<7x1xf32> to vector<7x7xf32>
    %121 = arith.mulf %116, %120 : vector<7x7xf32>
    %cst_49 = arith.constant dense<0.000000e+00> : vector<7x8xf32>
    %122 = tpu.matmul %121, %108, %cst_49 {dimension_numbers = #tpu.dot_dimension_numbers<[1], [0], [0], [1], [0, 0, 1, 1], [], []>} : vector<7x7xf32>, vector<7x8xf32>, vector<7x8xf32> -> vector<7x8xf32>
    %123 = vector.extract_strided_slice %56 {offsets = [16, 0], sizes = [8, 32], strides = [1, 1]} : vector<32x32xf32> to vector<8x32xf32>
    %cst_50 = arith.constant dense<0.000000e+00> : vector<7x32xf32>
    %124 = tpu.matmul %122, %123, %cst_50 {dimension_numbers = #tpu.dot_dimension_numbers<[1], [0], [0], [1], [0, 0, 1, 1], [], []>} : vector<7x8xf32>, vector<8x32xf32>, vector<7x32xf32> -> vector<7x32xf32>
    %125 = arith.addf %105, %124 : vector<7x32xf32>
    %126 = vector.extract_strided_slice %62 {offsets = [0, 24], sizes = [7, 8], strides = [1, 1]} : vector<7x32xf32> to vector<7x8xf32>
    %127 = vector.extract_strided_slice %63 {offsets = [0, 24], sizes = [7, 8], strides = [1, 1]} : vector<7x32xf32> to vector<7x8xf32>
    %128 = vector.extract_strided_slice %64 {offsets = [0, 24], sizes = [7, 8], strides = [1, 1]} : vector<7x32xf32> to vector<7x8xf32>
    %cst_51 = arith.constant dense<0.000000e+00> : vector<7x7xf32>
    %129 = tpu.matmul %126, %127, %cst_51 {dimension_numbers = #tpu.dot_dimension_numbers<[1], [1], [0], [0], [0, 0, 1, 0], [], []>} : vector<7x8xf32>, vector<7x8xf32>, vector<7x7xf32> -> vector<7x7xf32>
    %cst_52 = arith.constant 0.353553385 : f32
    %130 = vector.broadcast %cst_52 : f32 to vector<7x7xf32>
    %131 = arith.mulf %129, %130 : vector<7x7xf32>
    %cst_53 = arith.constant dense<0xFF800000> : vector<7xf32>
    %132 = vector.multi_reduction <maximumf>, %131, %cst_53 [1] : vector<7x7xf32> to vector<7xf32>
    %133 = vector.shape_cast %132 : vector<7xf32> to vector<7x1xf32>
    %134 = vector.broadcast %133 : vector<7x1xf32> to vector<7x7xf32>
    %135 = arith.subf %131, %134 : vector<7x7xf32>
    %136 = math.exp %135 : vector<7x7xf32>
    %cst_54 = arith.constant dense<0.000000e+00> : vector<7xf32>
    %137 = vector.multi_reduction <add>, %136, %cst_54 [1] : vector<7x7xf32> to vector<7xf32>
    %138 = vector.shape_cast %137 : vector<7xf32> to vector<7x1xf32>
    %139 = tpu.reciprocal %138 {approx = true} : vector<7x1xf32> -> vector<7x1xf32>
    %140 = vector.broadcast %139 : vector<7x1xf32> to vector<7x7xf32>
    %141 = arith.mulf %136, %140 : vector<7x7xf32>
    %cst_55 = arith.constant dense<0.000000e+00> : vector<7x8xf32>
    %142 = tpu.matmul %141, %128, %cst_55 {dimension_numbers = #tpu.dot_dimension_numbers<[1], [0], [0], [1], [0, 0, 1, 1], [], []>} : vector<7x7xf32>, vector<7x8xf32>, vector<7x8xf32> -> vector<7x8xf32>
    %143 = vector.extract_strided_slice %56 {offsets = [24, 0], sizes = [8, 32], strides = [1, 1]} : vector<32x32xf32> to vector<8x32xf32>
    %cst_56 = arith.constant dense<0.000000e+00> : vector<7x32xf32>
    %144 = tpu.matmul %142, %143, %cst_56 {dimension_numbers = #tpu.dot_dimension_numbers<[1], [0], [0], [1], [0, 0, 1, 1], [], []>} : vector<7x8xf32>, vector<8x32xf32>, vector<7x32xf32> -> vector<7x32xf32>
    %145 = arith.addf %125, %144 : vector<7x32xf32>
    %146 = vector.broadcast %58 : vector<1x32xf32> to vector<7x32xf32>
    %147 = arith.addf %145, %146 : vector<7x32xf32>
    %148 = arith.addf %50, %147 : vector<7x32xf32>
    %c0_57 = arith.constant 0 : index
    %c0_58 = arith.constant 0 : index
    %c0_59 = arith.constant 0 : index
    %149 = vector.load %arg13[%c0_57, %c0_58, %c0_59] : memref<2x1x32xf32, #tpu.memory_space<vmem>>, vector<1x1x32xf32>
    %150 = vector.shape_cast %149 : vector<1x1x32xf32> to vector<1x32xf32>
    %c0_60 = arith.constant 0 : index
    %c0_61 = arith.constant 0 : index
    %c0_62 = arith.constant 0 : index
    %151 = vector.load %arg14[%c0_60, %c0_61, %c0_62] : memref<2x1x32xf32, #tpu.memory_space<vmem>>, vector<1x1x32xf32>
    %152 = vector.shape_cast %151 : vector<1x1x32xf32> to vector<1x32xf32>
    %cst_63 = arith.constant dense<0.000000e+00> : vector<7xf32>
    %153 = vector.multi_reduction <add>, %148, %cst_63 [1] : vector<7x32xf32> to vector<7xf32>
    %154 = vector.shape_cast %153 : vector<7xf32> to vector<7x1xf32>
    %cst_64 = arith.constant 3.200000e+01 : f32
    %155 = vector.broadcast %cst_64 : f32 to vector<7x1xf32>
    %156 = arith.divf %154, %155 : vector<7x1xf32>
    %157 = vector.broadcast %156 : vector<7x1xf32> to vector<7x32xf32>
    %158 = arith.subf %148, %157 : vector<7x32xf32>
    %159 = vector.broadcast %156 : vector<7x1xf32> to vector<7x32xf32>
    %160 = arith.subf %148, %159 : vector<7x32xf32>
    %161 = arith.mulf %158, %160 : vector<7x32xf32>
    %cst_65 = arith.constant dense<0.000000e+00> : vector<7xf32>
    %162 = vector.multi_reduction <add>, %161, %cst_65 [1] : vector<7x32xf32> to vector<7xf32>
    %163 = vector.shape_cast %162 : vector<7xf32> to vector<7x1xf32>
    %cst_66 = arith.constant 3.200000e+01 : f32
    %164 = vector.broadcast %cst_66 : f32 to vector<7x1xf32>
    %165 = arith.divf %163, %164 : vector<7x1xf32>
    %166 = vector.broadcast %156 : vector<7x1xf32> to vector<7x32xf32>
    %167 = arith.subf %148, %166 : vector<7x32xf32>
    %cst_67 = arith.constant 9.99999974E-6 : f32
    %168 = vector.broadcast %cst_67 : f32 to vector<7x1xf32>
    %169 = arith.addf %165, %168 : vector<7x1xf32>
    %170 = math.rsqrt %169 : vector<7x1xf32>
    %171 = vector.broadcast %170 : vector<7x1xf32> to vector<7x32xf32>
    %172 = arith.mulf %167, %171 : vector<7x32xf32>
    %173 = vector.broadcast %150 : vector<1x32xf32> to vector<7x32xf32>
    %174 = arith.mulf %172, %173 : vector<7x32xf32>
    %175 = vector.broadcast %152 : vector<1x32xf32> to vector<7x32xf32>
    %176 = arith.addf %174, %175 : vector<7x32xf32>
    %c0_68 = arith.constant 0 : index
    %c0_69 = arith.constant 0 : index
    %c0_70 = arith.constant 0 : index
    %177 = vector.load %arg9[%c0_68, %c0_69, %c0_70] : memref<2x32x64xf32, #tpu.memory_space<vmem>>, vector<1x32x64xf32>
    %178 = vector.shape_cast %177 : vector<1x32x64xf32> to vector<32x64xf32>
    %cst_71 = arith.constant dense<0.000000e+00> : vector<7x64xf32>
    %179 = tpu.matmul %176, %178, %cst_71 {dimension_numbers = #tpu.dot_dimension_numbers<[1], [0], [0], [1], [0, 0, 1, 1], [], []>} : vector<7x32xf32>, vector<32x64xf32>, vector<7x64xf32> -> vector<7x64xf32>
    %c0_72 = arith.constant 0 : index
    %c0_73 = arith.constant 0 : index
    %c0_74 = arith.constant 0 : index
    %180 = vector.load %arg10[%c0_72, %c0_73, %c0_74] : memref<2x1x64xf32, #tpu.memory_space<vmem>>, vector<1x1x64xf32>
    %181 = vector.shape_cast %180 : vector<1x1x64xf32> to vector<1x64xf32>
    %182 = vector.broadcast %181 : vector<1x64xf32> to vector<7x64xf32>
    %183 = arith.addf %179, %182 : vector<7x64xf32>
    %184 = arith.mulf %183, %183 : vector<7x64xf32>
    %185 = arith.mulf %183, %184 : vector<7x64xf32>
    %cst_75 = arith.constant 4.471500e-02 : f32
    %186 = vector.broadcast %cst_75 : f32 to vector<7x64xf32>
    %187 = arith.mulf %186, %185 : vector<7x64xf32>
    %188 = arith.addf %183, %187 : vector<7x64xf32>
    %cst_76 = arith.constant 0.797884583 : f32
    %189 = vector.broadcast %cst_76 : f32 to vector<7x64xf32>
    %190 = arith.mulf %189, %188 : vector<7x64xf32>
    %191 = math.tanh %190 : vector<7x64xf32>
    %cst_77 = arith.constant 1.000000e+00 : f32
    %192 = vector.broadcast %cst_77 : f32 to vector<7x64xf32>
    %193 = arith.addf %192, %191 : vector<7x64xf32>
    %cst_78 = arith.constant 5.000000e-01 : f32
    %194 = vector.broadcast %cst_78 : f32 to vector<7x64xf32>
    %195 = arith.mulf %194, %193 : vector<7x64xf32>
    %196 = arith.mulf %183, %195 : vector<7x64xf32>
    %c0_79 = arith.constant 0 : index
    %c0_80 = arith.constant 0 : index
    %c0_81 = arith.constant 0 : index
    %197 = vector.load %arg11[%c0_79, %c0_80, %c0_81] : memref<2x64x32xf32, #tpu.memory_space<vmem>>, vector<1x64x32xf32>
    %198 = vector.shape_cast %197 : vector<1x64x32xf32> to vector<64x32xf32>
    %cst_82 = arith.constant dense<0.000000e+00> : vector<7x32xf32>
    %199 = tpu.matmul %196, %198, %cst_82 {dimension_numbers = #tpu.dot_dimension_numbers<[1], [0], [0], [1], [0, 0, 1, 1], [], []>} : vector<7x64xf32>, vector<64x32xf32>, vector<7x32xf32> -> vector<7x32xf32>
    %c0_83 = arith.constant 0 : index
    %c0_84 = arith.constant 0 : index
    %c0_85 = arith.constant 0 : index
    %200 = vector.load %arg12[%c0_83, %c0_84, %c0_85] : memref<2x1x32xf32, #tpu.memory_space<vmem>>, vector<1x1x32xf32>
    %201 = vector.shape_cast %200 : vector<1x1x32xf32> to vector<1x32xf32>
    %202 = vector.broadcast %201 : vector<1x32xf32> to vector<7x32xf32>
    %203 = arith.addf %199, %202 : vector<7x32xf32>
    %204 = arith.addf %176, %203 : vector<7x32xf32>
    %c0_86 = arith.constant 0 : index
    %c0_87 = arith.constant 0 : index
    %c0_88 = arith.constant 0 : index
    %205 = vector.load %arg15[%c0_86, %c0_87, %c0_88] : memref<2x1x32xf32, #tpu.memory_space<vmem>>, vector<1x1x32xf32>
    %206 = vector.shape_cast %205 : vector<1x1x32xf32> to vector<1x32xf32>
    %c0_89 = arith.constant 0 : index
    %c0_90 = arith.constant 0 : index
    %c0_91 = arith.constant 0 : index
    %207 = vector.load %arg16[%c0_89, %c0_90, %c0_91] : memref<2x1x32xf32, #tpu.memory_space<vmem>>, vector<1x1x32xf32>
    %208 = vector.shape_cast %207 : vector<1x1x32xf32> to vector<1x32xf32>
    %cst_92 = arith.constant dense<0.000000e+00> : vector<7xf32>
    %209 = vector.multi_reduction <add>, %204, %cst_92 [1] : vector<7x32xf32> to vector<7xf32>
    %210 = vector.shape_cast %209 : vector<7xf32> to vector<7x1xf32>
    %cst_93 = arith.constant 3.200000e+01 : f32
    %211 = vector.broadcast %cst_93 : f32 to vector<7x1xf32>
    %212 = arith.divf %210, %211 : vector<7x1xf32>
    %213 = vector.broadcast %212 : vector<7x1xf32> to vector<7x32xf32>
    %214 = arith.subf %204, %213 : vector<7x32xf32>
    %215 = vector.broadcast %212 : vector<7x1xf32> to vector<7x32xf32>
    %216 = arith.subf %204, %215 : vector<7x32xf32>
    %217 = arith.mulf %214, %216 : vector<7x32xf32>
    %cst_94 = arith.constant dense<0.000000e+00> : vector<7xf32>
    %218 = vector.multi_reduction <add>, %217, %cst_94 [1] : vector<7x32xf32> to vector<7xf32>
    %219 = vector.shape_cast %218 : vector<7xf32> to vector<7x1xf32>
    %cst_95 = arith.constant 3.200000e+01 : f32
    %220 = vector.broadcast %cst_95 : f32 to vector<7x1xf32>
    %221 = arith.divf %219, %220 : vector<7x1xf32>
    %222 = vector.broadcast %212 : vector<7x1xf32> to vector<7x32xf32>
    %223 = arith.subf %204, %222 : vector<7x32xf32>
    %cst_96 = arith.constant 9.99999974E-6 : f32
    %224 = vector.broadcast %cst_96 : f32 to vector<7x1xf32>
    %225 = arith.addf %221, %224 : vector<7x1xf32>
    %226 = math.rsqrt %225 : vector<7x1xf32>
    %227 = vector.broadcast %226 : vector<7x1xf32> to vector<7x32xf32>
    %228 = arith.mulf %223, %227 : vector<7x32xf32>
    %229 = vector.broadcast %206 : vector<1x32xf32> to vector<7x32xf32>
    %230 = arith.mulf %228, %229 : vector<7x32xf32>
    %231 = vector.broadcast %208 : vector<1x32xf32> to vector<7x32xf32>
    %232 = arith.addf %230, %231 : vector<7x32xf32>
    %c1 = arith.constant 1 : index
    %c0_97 = arith.constant 0 : index
    %c0_98 = arith.constant 0 : index
    %233 = vector.load %arg5[%c1, %c0_97, %c0_98] : memref<2x32x96xf32, #tpu.memory_space<vmem>>, vector<1x32x96xf32>
    %234 = vector.shape_cast %233 : vector<1x32x96xf32> to vector<32x96xf32>
    %c1_99 = arith.constant 1 : index
    %c0_100 = arith.constant 0 : index
    %c0_101 = arith.constant 0 : index
    %235 = vector.load %arg6[%c1_99, %c0_100, %c0_101] : memref<2x1x96xf32, #tpu.memory_space<vmem>>, vector<1x1x96xf32>
    %236 = vector.shape_cast %235 : vector<1x1x96xf32> to vector<1x96xf32>
    %c1_102 = arith.constant 1 : index
    %c0_103 = arith.constant 0 : index
    %c0_104 = arith.constant 0 : index
    %237 = vector.load %arg7[%c1_102, %c0_103, %c0_104] : memref<2x32x32xf32, #tpu.memory_space<vmem>>, vector<1x32x32xf32>
    %238 = vector.shape_cast %237 : vector<1x32x32xf32> to vector<32x32xf32>
    %c1_105 = arith.constant 1 : index
    %c0_106 = arith.constant 0 : index
    %c0_107 = arith.constant 0 : index
    %239 = vector.load %arg8[%c1_105, %c0_106, %c0_107] : memref<2x1x32xf32, #tpu.memory_space<vmem>>, vector<1x1x32xf32>
    %240 = vector.shape_cast %239 : vector<1x1x32xf32> to vector<1x32xf32>
    %cst_108 = arith.constant dense<0.000000e+00> : vector<7x96xf32>
    %241 = tpu.matmul %232, %234, %cst_108 {dimension_numbers = #tpu.dot_dimension_numbers<[1], [0], [0], [1], [0, 0, 1, 1], [], []>} : vector<7x32xf32>, vector<32x96xf32>, vector<7x96xf32> -> vector<7x96xf32>
    %242 = vector.broadcast %236 : vector<1x96xf32> to vector<7x96xf32>
    %243 = arith.addf %241, %242 : vector<7x96xf32>
    %244 = vector.extract_strided_slice %243 {offsets = [0, 0], sizes = [7, 32], strides = [1, 1]} : vector<7x96xf32> to vector<7x32xf32>
    %245 = vector.extract_strided_slice %243 {offsets = [0, 32], sizes = [7, 32], strides = [1, 1]} : vector<7x96xf32> to vector<7x32xf32>
    %246 = vector.extract_strided_slice %243 {offsets = [0, 64], sizes = [7, 32], strides = [1, 1]} : vector<7x96xf32> to vector<7x32xf32>
    %cst_109 = arith.constant 0.000000e+00 : f32
    %247 = vector.broadcast %cst_109 : f32 to vector<7x32xf32>
    %248 = vector.extract_strided_slice %244 {offsets = [0, 0], sizes = [7, 8], strides = [1, 1]} : vector<7x32xf32> to vector<7x8xf32>
    %249 = vector.extract_strided_slice %245 {offsets = [0, 0], sizes = [7, 8], strides = [1, 1]} : vector<7x32xf32> to vector<7x8xf32>
    %250 = vector.extract_strided_slice %246 {offsets = [0, 0], sizes = [7, 8], strides = [1, 1]} : vector<7x32xf32> to vector<7x8xf32>
    %cst_110 = arith.constant dense<0.000000e+00> : vector<7x7xf32>
    %251 = tpu.matmul %248, %249, %cst_110 {dimension_numbers = #tpu.dot_dimension_numbers<[1], [1], [0], [0], [0, 0, 1, 0], [], []>} : vector<7x8xf32>, vector<7x8xf32>, vector<7x7xf32> -> vector<7x7xf32>
    %cst_111 = arith.constant 0.353553385 : f32
    %252 = vector.broadcast %cst_111 : f32 to vector<7x7xf32>
    %253 = arith.mulf %251, %252 : vector<7x7xf32>
    %cst_112 = arith.constant dense<0xFF800000> : vector<7xf32>
    %254 = vector.multi_reduction <maximumf>, %253, %cst_112 [1] : vector<7x7xf32> to vector<7xf32>
    %255 = vector.shape_cast %254 : vector<7xf32> to vector<7x1xf32>
    %256 = vector.broadcast %255 : vector<7x1xf32> to vector<7x7xf32>
    %257 = arith.subf %253, %256 : vector<7x7xf32>
    %258 = math.exp %257 : vector<7x7xf32>
    %cst_113 = arith.constant dense<0.000000e+00> : vector<7xf32>
    %259 = vector.multi_reduction <add>, %258, %cst_113 [1] : vector<7x7xf32> to vector<7xf32>
    %260 = vector.shape_cast %259 : vector<7xf32> to vector<7x1xf32>
    %261 = tpu.reciprocal %260 {approx = true} : vector<7x1xf32> -> vector<7x1xf32>
    %262 = vector.broadcast %261 : vector<7x1xf32> to vector<7x7xf32>
    %263 = arith.mulf %258, %262 : vector<7x7xf32>
    %cst_114 = arith.constant dense<0.000000e+00> : vector<7x8xf32>
    %264 = tpu.matmul %263, %250, %cst_114 {dimension_numbers = #tpu.dot_dimension_numbers<[1], [0], [0], [1], [0, 0, 1, 1], [], []>} : vector<7x7xf32>, vector<7x8xf32>, vector<7x8xf32> -> vector<7x8xf32>
    %265 = vector.extract_strided_slice %238 {offsets = [0, 0], sizes = [8, 32], strides = [1, 1]} : vector<32x32xf32> to vector<8x32xf32>
    %cst_115 = arith.constant dense<0.000000e+00> : vector<7x32xf32>
    %266 = tpu.matmul %264, %265, %cst_115 {dimension_numbers = #tpu.dot_dimension_numbers<[1], [0], [0], [1], [0, 0, 1, 1], [], []>} : vector<7x8xf32>, vector<8x32xf32>, vector<7x32xf32> -> vector<7x32xf32>
    %267 = arith.addf %247, %266 : vector<7x32xf32>
    %268 = vector.extract_strided_slice %244 {offsets = [0, 8], sizes = [7, 8], strides = [1, 1]} : vector<7x32xf32> to vector<7x8xf32>
    %269 = vector.extract_strided_slice %245 {offsets = [0, 8], sizes = [7, 8], strides = [1, 1]} : vector<7x32xf32> to vector<7x8xf32>
    %270 = vector.extract_strided_slice %246 {offsets = [0, 8], sizes = [7, 8], strides = [1, 1]} : vector<7x32xf32> to vector<7x8xf32>
    %cst_116 = arith.constant dense<0.000000e+00> : vector<7x7xf32>
    %271 = tpu.matmul %268, %269, %cst_116 {dimension_numbers = #tpu.dot_dimension_numbers<[1], [1], [0], [0], [0, 0, 1, 0], [], []>} : vector<7x8xf32>, vector<7x8xf32>, vector<7x7xf32> -> vector<7x7xf32>
    %cst_117 = arith.constant 0.353553385 : f32
    %272 = vector.broadcast %cst_117 : f32 to vector<7x7xf32>
    %273 = arith.mulf %271, %272 : vector<7x7xf32>
    %cst_118 = arith.constant dense<0xFF800000> : vector<7xf32>
    %274 = vector.multi_reduction <maximumf>, %273, %cst_118 [1] : vector<7x7xf32> to vector<7xf32>
    %275 = vector.shape_cast %274 : vector<7xf32> to vector<7x1xf32>
    %276 = vector.broadcast %275 : vector<7x1xf32> to vector<7x7xf32>
    %277 = arith.subf %273, %276 : vector<7x7xf32>
    %278 = math.exp %277 : vector<7x7xf32>
    %cst_119 = arith.constant dense<0.000000e+00> : vector<7xf32>
    %279 = vector.multi_reduction <add>, %278, %cst_119 [1] : vector<7x7xf32> to vector<7xf32>
    %280 = vector.shape_cast %279 : vector<7xf32> to vector<7x1xf32>
    %281 = tpu.reciprocal %280 {approx = true} : vector<7x1xf32> -> vector<7x1xf32>
    %282 = vector.broadcast %281 : vector<7x1xf32> to vector<7x7xf32>
    %283 = arith.mulf %278, %282 : vector<7x7xf32>
    %cst_120 = arith.constant dense<0.000000e+00> : vector<7x8xf32>
    %284 = tpu.matmul %283, %270, %cst_120 {dimension_numbers = #tpu.dot_dimension_numbers<[1], [0], [0], [1], [0, 0, 1, 1], [], []>} : vector<7x7xf32>, vector<7x8xf32>, vector<7x8xf32> -> vector<7x8xf32>
    %285 = vector.extract_strided_slice %238 {offsets = [8, 0], sizes = [8, 32], strides = [1, 1]} : vector<32x32xf32> to vector<8x32xf32>
    %cst_121 = arith.constant dense<0.000000e+00> : vector<7x32xf32>
    %286 = tpu.matmul %284, %285, %cst_121 {dimension_numbers = #tpu.dot_dimension_numbers<[1], [0], [0], [1], [0, 0, 1, 1], [], []>} : vector<7x8xf32>, vector<8x32xf32>, vector<7x32xf32> -> vector<7x32xf32>
    %287 = arith.addf %267, %286 : vector<7x32xf32>
    %288 = vector.extract_strided_slice %244 {offsets = [0, 16], sizes = [7, 8], strides = [1, 1]} : vector<7x32xf32> to vector<7x8xf32>
    %289 = vector.extract_strided_slice %245 {offsets = [0, 16], sizes = [7, 8], strides = [1, 1]} : vector<7x32xf32> to vector<7x8xf32>
    %290 = vector.extract_strided_slice %246 {offsets = [0, 16], sizes = [7, 8], strides = [1, 1]} : vector<7x32xf32> to vector<7x8xf32>
    %cst_122 = arith.constant dense<0.000000e+00> : vector<7x7xf32>
    %291 = tpu.matmul %288, %289, %cst_122 {dimension_numbers = #tpu.dot_dimension_numbers<[1], [1], [0], [0], [0, 0, 1, 0], [], []>} : vector<7x8xf32>, vector<7x8xf32>, vector<7x7xf32> -> vector<7x7xf32>
    %cst_123 = arith.constant 0.353553385 : f32
    %292 = vector.broadcast %cst_123 : f32 to vector<7x7xf32>
    %293 = arith.mulf %291, %292 : vector<7x7xf32>
    %cst_124 = arith.constant dense<0xFF800000> : vector<7xf32>
    %294 = vector.multi_reduction <maximumf>, %293, %cst_124 [1] : vector<7x7xf32> to vector<7xf32>
    %295 = vector.shape_cast %294 : vector<7xf32> to vector<7x1xf32>
    %296 = vector.broadcast %295 : vector<7x1xf32> to vector<7x7xf32>
    %297 = arith.subf %293, %296 : vector<7x7xf32>
    %298 = math.exp %297 : vector<7x7xf32>
    %cst_125 = arith.constant dense<0.000000e+00> : vector<7xf32>
    %299 = vector.multi_reduction <add>, %298, %cst_125 [1] : vector<7x7xf32> to vector<7xf32>
    %300 = vector.shape_cast %299 : vector<7xf32> to vector<7x1xf32>
    %301 = tpu.reciprocal %300 {approx = true} : vector<7x1xf32> -> vector<7x1xf32>
    %302 = vector.broadcast %301 : vector<7x1xf32> to vector<7x7xf32>
    %303 = arith.mulf %298, %302 : vector<7x7xf32>
    %cst_126 = arith.constant dense<0.000000e+00> : vector<7x8xf32>
    %304 = tpu.matmul %303, %290, %cst_126 {dimension_numbers = #tpu.dot_dimension_numbers<[1], [0], [0], [1], [0, 0, 1, 1], [], []>} : vector<7x7xf32>, vector<7x8xf32>, vector<7x8xf32> -> vector<7x8xf32>
    %305 = vector.extract_strided_slice %238 {offsets = [16, 0], sizes = [8, 32], strides = [1, 1]} : vector<32x32xf32> to vector<8x32xf32>
    %cst_127 = arith.constant dense<0.000000e+00> : vector<7x32xf32>
    %306 = tpu.matmul %304, %305, %cst_127 {dimension_numbers = #tpu.dot_dimension_numbers<[1], [0], [0], [1], [0, 0, 1, 1], [], []>} : vector<7x8xf32>, vector<8x32xf32>, vector<7x32xf32> -> vector<7x32xf32>
    %307 = arith.addf %287, %306 : vector<7x32xf32>
    %308 = vector.extract_strided_slice %244 {offsets = [0, 24], sizes = [7, 8], strides = [1, 1]} : vector<7x32xf32> to vector<7x8xf32>
    %309 = vector.extract_strided_slice %245 {offsets = [0, 24], sizes = [7, 8], strides = [1, 1]} : vector<7x32xf32> to vector<7x8xf32>
    %310 = vector.extract_strided_slice %246 {offsets = [0, 24], sizes = [7, 8], strides = [1, 1]} : vector<7x32xf32> to vector<7x8xf32>
    %cst_128 = arith.constant dense<0.000000e+00> : vector<7x7xf32>
    %311 = tpu.matmul %308, %309, %cst_128 {dimension_numbers = #tpu.dot_dimension_numbers<[1], [1], [0], [0], [0, 0, 1, 0], [], []>} : vector<7x8xf32>, vector<7x8xf32>, vector<7x7xf32> -> vector<7x7xf32>
    %cst_129 = arith.constant 0.353553385 : f32
    %312 = vector.broadcast %cst_129 : f32 to vector<7x7xf32>
    %313 = arith.mulf %311, %312 : vector<7x7xf32>
    %cst_130 = arith.constant dense<0xFF800000> : vector<7xf32>
    %314 = vector.multi_reduction <maximumf>, %313, %cst_130 [1] : vector<7x7xf32> to vector<7xf32>
    %315 = vector.shape_cast %314 : vector<7xf32> to vector<7x1xf32>
    %316 = vector.broadcast %315 : vector<7x1xf32> to vector<7x7xf32>
    %317 = arith.subf %313, %316 : vector<7x7xf32>
    %318 = math.exp %317 : vector<7x7xf32>
    %cst_131 = arith.constant dense<0.000000e+00> : vector<7xf32>
    %319 = vector.multi_reduction <add>, %318, %cst_131 [1] : vector<7x7xf32> to vector<7xf32>
    %320 = vector.shape_cast %319 : vector<7xf32> to vector<7x1xf32>
    %321 = tpu.reciprocal %320 {approx = true} : vector<7x1xf32> -> vector<7x1xf32>
    %322 = vector.broadcast %321 : vector<7x1xf32> to vector<7x7xf32>
    %323 = arith.mulf %318, %322 : vector<7x7xf32>
    %cst_132 = arith.constant dense<0.000000e+00> : vector<7x8xf32>
    %324 = tpu.matmul %323, %310, %cst_132 {dimension_numbers = #tpu.dot_dimension_numbers<[1], [0], [0], [1], [0, 0, 1, 1], [], []>} : vector<7x7xf32>, vector<7x8xf32>, vector<7x8xf32> -> vector<7x8xf32>
    %325 = vector.extract_strided_slice %238 {offsets = [24, 0], sizes = [8, 32], strides = [1, 1]} : vector<32x32xf32> to vector<8x32xf32>
    %cst_133 = arith.constant dense<0.000000e+00> : vector<7x32xf32>
    %326 = tpu.matmul %324, %325, %cst_133 {dimension_numbers = #tpu.dot_dimension_numbers<[1], [0], [0], [1], [0, 0, 1, 1], [], []>} : vector<7x8xf32>, vector<8x32xf32>, vector<7x32xf32> -> vector<7x32xf32>
    %327 = arith.addf %307, %326 : vector<7x32xf32>
    %328 = vector.broadcast %240 : vector<1x32xf32> to vector<7x32xf32>
    %329 = arith.addf %327, %328 : vector<7x32xf32>
    %330 = arith.addf %232, %329 : vector<7x32xf32>
    %c1_134 = arith.constant 1 : index
    %c0_135 = arith.constant 0 : index
    %c0_136 = arith.constant 0 : index
    %331 = vector.load %arg13[%c1_134, %c0_135, %c0_136] : memref<2x1x32xf32, #tpu.memory_space<vmem>>, vector<1x1x32xf32>
    %332 = vector.shape_cast %331 : vector<1x1x32xf32> to vector<1x32xf32>
    %c1_137 = arith.constant 1 : index
    %c0_138 = arith.constant 0 : index
    %c0_139 = arith.constant 0 : index
    %333 = vector.load %arg14[%c1_137, %c0_138, %c0_139] : memref<2x1x32xf32, #tpu.memory_space<vmem>>, vector<1x1x32xf32>
    %334 = vector.shape_cast %333 : vector<1x1x32xf32> to vector<1x32xf32>
    %cst_140 = arith.constant dense<0.000000e+00> : vector<7xf32>
    %335 = vector.multi_reduction <add>, %330, %cst_140 [1] : vector<7x32xf32> to vector<7xf32>
    %336 = vector.shape_cast %335 : vector<7xf32> to vector<7x1xf32>
    %cst_141 = arith.constant 3.200000e+01 : f32
    %337 = vector.broadcast %cst_141 : f32 to vector<7x1xf32>
    %338 = arith.divf %336, %337 : vector<7x1xf32>
    %339 = vector.broadcast %338 : vector<7x1xf32> to vector<7x32xf32>
    %340 = arith.subf %330, %339 : vector<7x32xf32>
    %341 = vector.broadcast %338 : vector<7x1xf32> to vector<7x32xf32>
    %342 = arith.subf %330, %341 : vector<7x32xf32>
    %343 = arith.mulf %340, %342 : vector<7x32xf32>
    %cst_142 = arith.constant dense<0.000000e+00> : vector<7xf32>
    %344 = vector.multi_reduction <add>, %343, %cst_142 [1] : vector<7x32xf32> to vector<7xf32>
    %345 = vector.shape_cast %344 : vector<7xf32> to vector<7x1xf32>
    %cst_143 = arith.constant 3.200000e+01 : f32
    %346 = vector.broadcast %cst_143 : f32 to vector<7x1xf32>
    %347 = arith.divf %345, %346 : vector<7x1xf32>
    %348 = vector.broadcast %338 : vector<7x1xf32> to vector<7x32xf32>
    %349 = arith.subf %330, %348 : vector<7x32xf32>
    %cst_144 = arith.constant 9.99999974E-6 : f32
    %350 = vector.broadcast %cst_144 : f32 to vector<7x1xf32>
    %351 = arith.addf %347, %350 : vector<7x1xf32>
    %352 = math.rsqrt %351 : vector<7x1xf32>
    %353 = vector.broadcast %352 : vector<7x1xf32> to vector<7x32xf32>
    %354 = arith.mulf %349, %353 : vector<7x32xf32>
    %355 = vector.broadcast %332 : vector<1x32xf32> to vector<7x32xf32>
    %356 = arith.mulf %354, %355 : vector<7x32xf32>
    %357 = vector.broadcast %334 : vector<1x32xf32> to vector<7x32xf32>
    %358 = arith.addf %356, %357 : vector<7x32xf32>
    %c1_145 = arith.constant 1 : index
    %c0_146 = arith.constant 0 : index
    %c0_147 = arith.constant 0 : index
    %359 = vector.load %arg9[%c1_145, %c0_146, %c0_147] : memref<2x32x64xf32, #tpu.memory_space<vmem>>, vector<1x32x64xf32>
    %360 = vector.shape_cast %359 : vector<1x32x64xf32> to vector<32x64xf32>
    %cst_148 = arith.constant dense<0.000000e+00> : vector<7x64xf32>
    %361 = tpu.matmul %358, %360, %cst_148 {dimension_numbers = #tpu.dot_dimension_numbers<[1], [0], [0], [1], [0, 0, 1, 1], [], []>} : vector<7x32xf32>, vector<32x64xf32>, vector<7x64xf32> -> vector<7x64xf32>
    %c1_149 = arith.constant 1 : index
    %c0_150 = arith.constant 0 : index
    %c0_151 = arith.constant 0 : index
    %362 = vector.load %arg10[%c1_149, %c0_150, %c0_151] : memref<2x1x64xf32, #tpu.memory_space<vmem>>, vector<1x1x64xf32>
    %363 = vector.shape_cast %362 : vector<1x1x64xf32> to vector<1x64xf32>
    %364 = vector.broadcast %363 : vector<1x64xf32> to vector<7x64xf32>
    %365 = arith.addf %361, %364 : vector<7x64xf32>
    %366 = arith.mulf %365, %365 : vector<7x64xf32>
    %367 = arith.mulf %365, %366 : vector<7x64xf32>
    %cst_152 = arith.constant 4.471500e-02 : f32
    %368 = vector.broadcast %cst_152 : f32 to vector<7x64xf32>
    %369 = arith.mulf %368, %367 : vector<7x64xf32>
    %370 = arith.addf %365, %369 : vector<7x64xf32>
    %cst_153 = arith.constant 0.797884583 : f32
    %371 = vector.broadcast %cst_153 : f32 to vector<7x64xf32>
    %372 = arith.mulf %371, %370 : vector<7x64xf32>
    %373 = math.tanh %372 : vector<7x64xf32>
    %cst_154 = arith.constant 1.000000e+00 : f32
    %374 = vector.broadcast %cst_154 : f32 to vector<7x64xf32>
    %375 = arith.addf %374, %373 : vector<7x64xf32>
    %cst_155 = arith.constant 5.000000e-01 : f32
    %376 = vector.broadcast %cst_155 : f32 to vector<7x64xf32>
    %377 = arith.mulf %376, %375 : vector<7x64xf32>
    %378 = arith.mulf %365, %377 : vector<7x64xf32>
    %c1_156 = arith.constant 1 : index
    %c0_157 = arith.constant 0 : index
    %c0_158 = arith.constant 0 : index
    %379 = vector.load %arg11[%c1_156, %c0_157, %c0_158] : memref<2x64x32xf32, #tpu.memory_space<vmem>>, vector<1x64x32xf32>
    %380 = vector.shape_cast %379 : vector<1x64x32xf32> to vector<64x32xf32>
    %cst_159 = arith.constant dense<0.000000e+00> : vector<7x32xf32>
    %381 = tpu.matmul %378, %380, %cst_159 {dimension_numbers = #tpu.dot_dimension_numbers<[1], [0], [0], [1], [0, 0, 1, 1], [], []>} : vector<7x64xf32>, vector<64x32xf32>, vector<7x32xf32> -> vector<7x32xf32>
    %c1_160 = arith.constant 1 : index
    %c0_161 = arith.constant 0 : index
    %c0_162 = arith.constant 0 : index
    %382 = vector.load %arg12[%c1_160, %c0_161, %c0_162] : memref<2x1x32xf32, #tpu.memory_space<vmem>>, vector<1x1x32xf32>
    %383 = vector.shape_cast %382 : vector<1x1x32xf32> to vector<1x32xf32>
    %384 = vector.broadcast %383 : vector<1x32xf32> to vector<7x32xf32>
    %385 = arith.addf %381, %384 : vector<7x32xf32>
    %386 = arith.addf %358, %385 : vector<7x32xf32>
    %c1_163 = arith.constant 1 : index
    %c0_164 = arith.constant 0 : index
    %c0_165 = arith.constant 0 : index
    %387 = vector.load %arg15[%c1_163, %c0_164, %c0_165] : memref<2x1x32xf32, #tpu.memory_space<vmem>>, vector<1x1x32xf32>
    %388 = vector.shape_cast %387 : vector<1x1x32xf32> to vector<1x32xf32>
    %c1_166 = arith.constant 1 : index
    %c0_167 = arith.constant 0 : index
    %c0_168 = arith.constant 0 : index
    %389 = vector.load %arg16[%c1_166, %c0_167, %c0_168] : memref<2x1x32xf32, #tpu.memory_space<vmem>>, vector<1x1x32xf32>
    %390 = vector.shape_cast %389 : vector<1x1x32xf32> to vector<1x32xf32>
    %cst_169 = arith.constant dense<0.000000e+00> : vector<7xf32>
    %391 = vector.multi_reduction <add>, %386, %cst_169 [1] : vector<7x32xf32> to vector<7xf32>
    %392 = vector.shape_cast %391 : vector<7xf32> to vector<7x1xf32>
    %cst_170 = arith.constant 3.200000e+01 : f32
    %393 = vector.broadcast %cst_170 : f32 to vector<7x1xf32>
    %394 = arith.divf %392, %393 : vector<7x1xf32>
    %395 = vector.broadcast %394 : vector<7x1xf32> to vector<7x32xf32>
    %396 = arith.subf %386, %395 : vector<7x32xf32>
    %397 = vector.broadcast %394 : vector<7x1xf32> to vector<7x32xf32>
    %398 = arith.subf %386, %397 : vector<7x32xf32>
    %399 = arith.mulf %396, %398 : vector<7x32xf32>
    %cst_171 = arith.constant dense<0.000000e+00> : vector<7xf32>
    %400 = vector.multi_reduction <add>, %399, %cst_171 [1] : vector<7x32xf32> to vector<7xf32>
    %401 = vector.shape_cast %400 : vector<7xf32> to vector<7x1xf32>
    %cst_172 = arith.constant 3.200000e+01 : f32
    %402 = vector.broadcast %cst_172 : f32 to vector<7x1xf32>
    %403 = arith.divf %401, %402 : vector<7x1xf32>
    %404 = vector.broadcast %394 : vector<7x1xf32> to vector<7x32xf32>
    %405 = arith.subf %386, %404 : vector<7x32xf32>
    %cst_173 = arith.constant 9.99999974E-6 : f32
    %406 = vector.broadcast %cst_173 : f32 to vector<7x1xf32>
    %407 = arith.addf %403, %406 : vector<7x1xf32>
    %408 = math.rsqrt %407 : vector<7x1xf32>
    %409 = vector.broadcast %408 : vector<7x1xf32> to vector<7x32xf32>
    %410 = arith.mulf %405, %409 : vector<7x32xf32>
    %411 = vector.broadcast %388 : vector<1x32xf32> to vector<7x32xf32>
    %412 = arith.mulf %410, %411 : vector<7x32xf32>
    %413 = vector.broadcast %390 : vector<1x32xf32> to vector<7x32xf32>
    %414 = arith.addf %412, %413 : vector<7x32xf32>
    %c0_174 = arith.constant 0 : index
    %c0_175 = arith.constant 0 : index
    %415 = vector.load %arg17[%c0_174, %c0_175] : memref<1x32xf32, #tpu.memory_space<vmem>>, vector<1x32xf32>
    %c0_176 = arith.constant 0 : index
    %c0_177 = arith.constant 0 : index
    %416 = vector.load %arg18[%c0_176, %c0_177] : memref<1x32xf32, #tpu.memory_space<vmem>>, vector<1x32xf32>
    %cst_178 = arith.constant dense<0.000000e+00> : vector<7xf32>
    %417 = vector.multi_reduction <add>, %414, %cst_178 [1] : vector<7x32xf32> to vector<7xf32>
    %418 = vector.shape_cast %417 : vector<7xf32> to vector<7x1xf32>
    %cst_179 = arith.constant 3.200000e+01 : f32
    %419 = vector.broadcast %cst_179 : f32 to vector<7x1xf32>
    %420 = arith.divf %418, %419 : vector<7x1xf32>
    %421 = vector.broadcast %420 : vector<7x1xf32> to vector<7x32xf32>
    %422 = arith.subf %414, %421 : vector<7x32xf32>
    %423 = vector.broadcast %420 : vector<7x1xf32> to vector<7x32xf32>
    %424 = arith.subf %414, %423 : vector<7x32xf32>
    %425 = arith.mulf %422, %424 : vector<7x32xf32>
    %cst_180 = arith.constant dense<0.000000e+00> : vector<7xf32>
    %426 = vector.multi_reduction <add>, %425, %cst_180 [1] : vector<7x32xf32> to vector<7xf32>
    %427 = vector.shape_cast %426 : vector<7xf32> to vector<7x1xf32>
    %cst_181 = arith.constant 3.200000e+01 : f32
    %428 = vector.broadcast %cst_181 : f32 to vector<7x1xf32>
    %429 = arith.divf %427, %428 : vector<7x1xf32>
    %430 = vector.broadcast %420 : vector<7x1xf32> to vector<7x32xf32>
    %431 = arith.subf %414, %430 : vector<7x32xf32>
    %cst_182 = arith.constant 9.99999974E-6 : f32
    %432 = vector.broadcast %cst_182 : f32 to vector<7x1xf32>
    %433 = arith.addf %429, %432 : vector<7x1xf32>
    %434 = math.rsqrt %433 : vector<7x1xf32>
    %435 = vector.broadcast %434 : vector<7x1xf32> to vector<7x32xf32>
    %436 = arith.mulf %431, %435 : vector<7x32xf32>
    %437 = vector.broadcast %415 : vector<1x32xf32> to vector<7x32xf32>
    %438 = arith.mulf %436, %437 : vector<7x32xf32>
    %439 = vector.broadcast %416 : vector<1x32xf32> to vector<7x32xf32>
    %440 = arith.addf %438, %439 : vector<7x32xf32>
    %441 = vector.extract_strided_slice %440 {offsets = [0, 0], sizes = [4, 32], strides = [1, 1]} : vector<7x32xf32> to vector<4x32xf32>
    %c0_183 = arith.constant 0 : index
    %c0_184 = arith.constant 0 : index
    %442 = vector.load %arg19[%c0_183, %c0_184] : memref<8x32xf32, #tpu.memory_space<vmem>>, vector<8x32xf32>
    %cst_185 = arith.constant dense<0.000000e+00> : vector<8x4xf32>
    %443 = tpu.matmul %442, %441, %cst_185 {dimension_numbers = #tpu.dot_dimension_numbers<[1], [1], [0], [0], [0, 0, 1, 0], [], []>} : vector<8x32xf32>, vector<4x32xf32>, vector<8x4xf32> -> vector<8x4xf32>
    %c0_186 = arith.constant 0 : index
    %c0_187 = arith.constant 0 : index
    %444 = vector.load %arg20[%c0_186, %c0_187] : memref<8x1xf32, #tpu.memory_space<vmem>>, vector<8x1xf32>
    %445 = vector.broadcast %444 : vector<8x1xf32> to vector<8x4xf32>
    %446 = arith.addf %443, %445 : vector<8x4xf32>
    %447 = vector.broadcast %19 : vector<1x4xf32> to vector<8x4xf32>
    %448 = arith.mulf %446, %447 : vector<8x4xf32>
    %449 = vector.broadcast %7 : vector<1x4xf32> to vector<8x4xf32>
    %450 = arith.addf %448, %449 : vector<8x4xf32>
    %c0_188 = arith.constant 0 : index
    %c0_189 = arith.constant 0 : index
    %c0_190 = arith.constant 0 : index
    %451 = vector.load %arg21[%c0_188, %c0_189, %c0_190] : memref<1x8x4xf32, #tpu.memory_space<vmem>>, vector<1x8x4xf32>
    %452 = vector.shape_cast %451 : vector<1x8x4xf32> to vector<8x4xf32>
    %453 = vector.shape_cast %450 : vector<8x4xf32> to vector<1x8x4xf32>
    tpu.vector_store %arg21[%c0_188, %c0_189, %c0_190], %453 {strides = array<i32>} : memref<1x8x4xf32, #tpu.memory_space<vmem>>, vector<1x8x4xf32>,
    return
  }
  func.func @transform_0(%arg0: i32) -> (i32, i32, i32) {
    %c0_i32 = arith.constant 0 : i32
    %c0_i32_0 = arith.constant 0 : i32
    %c0_i32_1 = arith.constant 0 : i32
    return %arg0, %c0_i32, %c0_i32_0 : i32, i32, i32
  }
  func.func @transform_1(%arg0: i32) -> (i32, i32, i32) {
    %c0_i32 = arith.constant 0 : i32
    %c0_i32_0 = arith.constant 0 : i32
    %c0_i32_1 = arith.constant 0 : i32
    return %arg0, %c0_i32, %c0_i32_0 : i32, i32, i32
  }
  func.func @transform_2(%arg0: i32) -> (i32, i32) {
    %c0_i32 = arith.constant 0 : i32
    %c0_i32_0 = arith.constant 0 : i32
    %c0_i32_1 = arith.constant 0 : i32
    return %c0_i32, %c0_i32_0 : i32, i32
  }
  func.func @transform_3(%arg0: i32) -> (i32, i32) {
    %c0_i32 = arith.constant 0 : i32
    %c0_i32_0 = arith.constant 0 : i32
    %c0_i32_1 = arith.constant 0 : i32
    return %c0_i32, %c0_i32_0 : i32, i32
  }
  func.func @transform_4(%arg0: i32) -> (i32, i32, i32) {
    %c0_i32 = arith.constant 0 : i32
    %c0_i32_0 = arith.constant 0 : i32
    %c0_i32_1 = arith.constant 0 : i32
    %c0_i32_2 = arith.constant 0 : i32
    return %c0_i32, %c0_i32_0, %c0_i32_1 : i32, i32, i32
  }
  func.func @transform_5(%arg0: i32) -> (i32, i32, i32) {
    %c0_i32 = arith.constant 0 : i32
    %c0_i32_0 = arith.constant 0 : i32
    %c0_i32_1 = arith.constant 0 : i32
    %c0_i32_2 = arith.constant 0 : i32
    return %c0_i32, %c0_i32_0, %c0_i32_1 : i32, i32, i32
  }
  func.func @transform_6(%arg0: i32) -> (i32, i32, i32) {
    %c0_i32 = arith.constant 0 : i32
    %c0_i32_0 = arith.constant 0 : i32
    %c0_i32_1 = arith.constant 0 : i32
    %c0_i32_2 = arith.constant 0 : i32
    return %c0_i32, %c0_i32_0, %c0_i32_1 : i32, i32, i32
  }
  func.func @transform_7(%arg0: i32) -> (i32, i32, i32) {
    %c0_i32 = arith.constant 0 : i32
    %c0_i32_0 = arith.constant 0 : i32
    %c0_i32_1 = arith.constant 0 : i32
    %c0_i32_2 = arith.constant 0 : i32
    return %c0_i32, %c0_i32_0, %c0_i32_1 : i32, i32, i32
  }
  func.func @transform_8(%arg0: i32) -> (i32, i32, i32) {
    %c0_i32 = arith.constant 0 : i32
    %c0_i32_0 = arith.constant 0 : i32
    %c0_i32_1 = arith.constant 0 : i32
    %c0_i32_2 = arith.constant 0 : i32
    return %c0_i32, %c0_i32_0, %c0_i32_1 : i32, i32, i32
  }
  func.func @transform_9(%arg0: i32) -> (i32, i32, i32) {
    %c0_i32 = arith.constant 0 : i32
    %c0_i32_0 = arith.constant 0 : i32
    %c0_i32_1 = arith.constant 0 : i32
    %c0_i32_2 = arith.constant 0 : i32
    return %c0_i32, %c0_i32_0, %c0_i32_1 : i32, i32, i32
  }
  func.func @transform_10(%arg0: i32) -> (i32, i32, i32) {
    %c0_i32 = arith.constant 0 : i32
    %c0_i32_0 = arith.constant 0 : i32
    %c0_i32_1 = arith.constant 0 : i32
    %c0_i32_2 = arith.constant 0 : i32
    return %c0_i32, %c0_i32_0, %c0_i32_1 : i32, i32, i32
  }
  func.func @transform_11(%arg0: i32) -> (i32, i32, i32) {
    %c0_i32 = arith.constant 0 : i32
    %c0_i32_0 = arith.constant 0 : i32
    %c0_i32_1 = arith.constant 0 : i32
    %c0_i32_2 = arith.constant 0 : i32
    return %c0_i32, %c0_i32_0, %c0_i32_1 : i32, i32, i32
  }
  func.func @transform_12(%arg0: i32) -> (i32, i32, i32) {
    %c0_i32 = arith.constant 0 : i32
    %c0_i32_0 = arith.constant 0 : i32
    %c0_i32_1 = arith.constant 0 : i32
    %c0_i32_2 = arith.constant 0 : i32
    return %c0_i32, %c0_i32_0, %c0_i32_1 : i32, i32, i32
  }
  func.func @transform_13(%arg0: i32) -> (i32, i32, i32) {
    %c0_i32 = arith.constant 0 : i32
    %c0_i32_0 = arith.constant 0 : i32
    %c0_i32_1 = arith.constant 0 : i32
    %c0_i32_2 = arith.constant 0 : i32
    return %c0_i32, %c0_i32_0, %c0_i32_1 : i32, i32, i32
  }
  func.func @transform_14(%arg0: i32) -> (i32, i32, i32) {
    %c0_i32 = arith.constant 0 : i32
    %c0_i32_0 = arith.constant 0 : i32
    %c0_i32_1 = arith.constant 0 : i32
    %c0_i32_2 = arith.constant 0 : i32
    return %c0_i32, %c0_i32_0, %c0_i32_1 : i32, i32, i32
  }
  func.func @transform_15(%arg0: i32) -> (i32, i32, i32) {
    %c0_i32 = arith.constant 0 : i32
    %c0_i32_0 = arith.constant 0 : i32
    %c0_i32_1 = arith.constant 0 : i32
    %c0_i32_2 = arith.constant 0 : i32
    return %c0_i32, %c0_i32_0, %c0_i32_1 : i32, i32, i32
  }
  func.func @transform_16(%arg0: i32) -> (i32, i32) {
    %c0_i32 = arith.constant 0 : i32
    %c0_i32_0 = arith.constant 0 : i32
    %c0_i32_1 = arith.constant 0 : i32
    return %c0_i32, %c0_i32_0 : i32, i32
  }
  func.func @transform_17(%arg0: i32) -> (i32, i32) {
    %c0_i32 = arith.constant 0 : i32
    %c0_i32_0 = arith.constant 0 : i32
    %c0_i32_1 = arith.constant 0 : i32
    return %c0_i32, %c0_i32_0 : i32, i32
  }
  func.func @transform_18(%arg0: i32) -> (i32, i32) {
    %c0_i32 = arith.constant 0 : i32
    %c0_i32_0 = arith.constant 0 : i32
    %c0_i32_1 = arith.constant 0 : i32
    return %c0_i32, %c0_i32_0 : i32, i32
  }
  func.func @transform_19(%arg0: i32) -> (i32, i32) {
    %c0_i32 = arith.constant 0 : i32
    %c0_i32_0 = arith.constant 0 : i32
    %c0_i32_1 = arith.constant 0 : i32
    return %c0_i32, %c0_i32_0 : i32, i32
  }
  func.func @transform_20(%arg0: i32) -> (i32, i32, i32) {
    %c0_i32 = arith.constant 0 : i32
    %c0_i32_0 = arith.constant 0 : i32
    %c0_i32_1 = arith.constant 0 : i32
    return %arg0, %c0_i32, %c0_i32_0 : i32, i32, i32
  }
}

</mosaic_0001>

<bundles_post_ra>
// kernel: tpu_custom_call.1
= control target key start
LH: loop header
LB: loop body
LE: loop exit
PB: predicated region body
PF: predicated region fallthrough
CT: control target
= control target key end

     0   :  { %s3309_s0 = inlined_call_operand.vmem [shape: f32[2,16,4], index: 0, kind: input, shape index: {}]   ;;  %s3310_s1 = inlined_call_operand.vmem [shape: f32[2,7,16], index: 1, kind: input, shape index: {}]   ;;  %s3311_s2 = inlined_call_operand.vmem [shape: f32[16,32], index: 2, kind: input, shape index: {}]   ;;  %s3312_s3 = inlined_call_operand.hbm [shape: f32[1,32], index: 3, kind: input, shape index: {}]   ;;  %s3313_s4 = inlined_call_operand.vmem [shape: f32[2,32,96], index: 4, kind: input, shape index: {}]   ;;  %s3314_s5 = inlined_call_operand.hbm [shape: f32[2,1,96], index: 5, kind: input, shape index: {}]   ;;  %s3315_s6 = inlined_call_operand.vmem [shape: f32[2,32,32], index: 6, kind: input, shape index: {}]   ;;  %s3316_s7 = inlined_call_operand.hbm [shape: f32[2,1,32], index: 7, kind: input, shape index: {}]   ;;  %s3317_s8 = inlined_call_operand.vmem [shape: f32[2,32,64], index: 8, kind: input, shape index: {}]   ;;  %s3318_s9 = inlined_call_operand.hbm [shape: f32[2,1,64], index: 9, kind: input, shape index: {}]   ;;  %s3319_s10 = inlined_call_operand.vmem [shape: f32[2,64,32], index: 10, kind: input, shape index: {}]   ;;  %s3320_s11 = inlined_call_operand.hbm [shape: f32[2,1,32], index: 11, kind: input, shape index: {}]   ;;  %s3321_s12 = inlined_call_operand.hbm [shape: f32[2,1,32], index: 12, kind: input, shape index: {}]   ;;  %s3322_s13 = inlined_call_operand.hbm [shape: f32[2,1,32], index: 13, kind: input, shape index: {}]   ;;  %s3323_s14 = inlined_call_operand.hbm [shape: f32[2,1,32], index: 14, kind: input, shape index: {}]   ;;  %s3324_s15 = inlined_call_operand.vmem [shape: f32[2,1,32], index: 15, kind: input, shape index: {}]   ;;  %s3325_s16 = inlined_call_operand.vmem [shape: f32[1,32], index: 16, kind: input, shape index: {}]   ;;  %s3326_s17 = inlined_call_operand.vmem [shape: f32[1,32], index: 17, kind: input, shape index: {}]   ;;  %s3327_s18 = inlined_call_operand.vmem [shape: f32[8,32], index: 18, kind: input, shape index: {}]   ;;  %s3328_s19 = inlined_call_operand.vmem [shape: f32[8,1], index: 19, kind: input, shape index: {}]   ;;  %s3329_s20 = inlined_call_operand.vmem [shape: f32[2,8,4], index: 20, kind: output, shape index: {}]  }
   0x1   :  { %3340 = sst [smem:[#allocation21_spill]] %s3309_s0 }
   0x2   :  { %3341 = sst [smem:[#allocation22_spill]] %s3310_s1 }
   0x3   :  { %3342 = sst [smem:[#allocation23_spill]] %s3311_s2 }
   0x4   :  { %3343 = sst [smem:[#allocation24_spill]] %s3312_s3 }
   0x5   :  { %3344 = sst [smem:[#allocation25_spill]] %s3313_s4 }
   0x6   :  { %3345 = sst [smem:[#allocation26_spill]] %s3314_s5 }
   0x7   :  { %3346 = sst [smem:[#allocation27_spill]] %s3318_s9 }
   0x8   :  { %3347 = sst [smem:[#allocation28_spill]] %s3321_s12 }
   0x9   :  { %25 = vsyncpa [#allocation3], 0 }
   0xa   :  { %26 = vsyncpa [#allocation5], 0 }
   0xb   :  { %27 = vsyncpa [#allocation8], 0 }
   0xc   :  { %28 = vsyncpa [#allocation11], 0 }
   0xd   :  { %29 = vsyncpa [#allocation14], 0  ;;  %s2880_s1 = smov 0  }
   0xe LB: > { %3348 = sst [smem:[#allocation20_spill]] %s2749_s1  ;;  %s2889_s2 = sadd.s32 4294967295, %s2749_s1   ;;  %s2749_s1 = sphi %s2880_s1, %s35_s1  }
   0xf   : > { %s3349_s5 = sld [smem:[#allocation26_spill]]  ;;  %p2207_p0 = scmp.ge.s32.totalorder %s2749_s1, 1 }
  0x10   : > { %p496_p1 = scmp.lt.s32.totalorder %s2749_s1, 3  ;;  %p2360_p2 = scmp.eq.s32.totalorder %s2889_s2, 0 }
  0x11   : > { %s2751_s3 = smov [#allocation4]   ;;  %s3351_s9 = sld [smem:[#allocation27_spill]] }
  0x12   : > { %p2894_p3 = pnand %p2207_p0, %p496_p1  ;;  %s527_s26 = sshll.u32 %s2751_s3, 4  ;;  %s528_s26 = int_to_ptr.vmem [resolvable:$true] %s527_s26 }
  0x13   : > { %s2752_s30 = smov [#allocation7]   ;;  %s3353_s12 = sld [smem:[#allocation28_spill]] }
  0x14   : > { %p2335_p4 = pneg %p2894_p3  ;;  %s561_s0 = sshll.u32 %s2752_s30, 4  ;;  %s562_s0 = int_to_ptr.vmem [resolvable:$true] %s561_s0 }
  0x15   : > { %s525_s24 = sshll.u32 %s3349_s5, 4  ;;  %s2753_s3 = smov 16   ;;  %s526_s24 = int_to_ptr.hbm [resolvable:$true] %s525_s24 }
  0x16   : > { %p2905_p5 = pnand %p2360_p2, %p2335_p4  ;;  %s2754_s27 = smov 1  }
  0x17   : > { %s559_s4 = sshll.u32 %s3351_s9, 4  ;;  %s2755_s28 = smov [#allocation10]   ;;  %s560_s4 = int_to_ptr.hbm [resolvable:$true] %s559_s4 }
  0x18   : > { %2341 = dma.hbm_to_vmem [thread:$0]  (!%p2905_p5), %s526_s24, 32, %s528_s26, [#allocation5], %s2753_s3, %s2753_s3, %s2754_s27  }
  0x19   : > { %s590_s23 = sshll.u32 %s3353_s12, 4  ;;  %s592_s30 = sshll.u32 %s2755_s28, 4  ;;  %s591_s23 = int_to_ptr.hbm [resolvable:$true] %s590_s23  ;;  %s593_s30 = int_to_ptr.vmem [resolvable:$true] %s592_s30 }
  0x1a   : > { %2347 = dma.hbm_to_vmem [thread:$0]  (!%p2905_p5), %s560_s4, 32, %s562_s0, [#allocation8], %s2753_s3, %s2753_s3, %s2754_s27  }
  0x1b   : > { %s3354_s22 = sld [smem:[#allocation24_spill]]  ;;  %s542_s12 = sshll.u32 %s3316_s7, 4  ;;  %s543_s12 = int_to_ptr.hbm [resolvable:$true] %s542_s12 }
  0x1c   : > { %2353 = dma.hbm_to_vmem [thread:$0]  (!%p2905_p5), %s591_s23, 32, %s593_s30, [#allocation11], %s2753_s3, %s2753_s3, %s2754_s27  }
  0x1d   : > { %s2756_s4 = smov [#allocation2]   ;;  %s2757_s5 = smov [#allocation6]  }
  0x1e   : > { %s513_s0 = sshll.u32 %s2756_s4, 4  ;;  %s544_s28 = sshll.u32 %s2757_s5, 4  ;;  %s514_s0 = int_to_ptr.vmem [resolvable:$true] %s513_s0  ;;  %s545_s28 = int_to_ptr.vmem [resolvable:$true] %s544_s28 }
  0x1f   : > { %s576_s1 = sshll.u32 %s3320_s11, 4  ;;  %s604_s24 = sshll.u32 %s3322_s13, 4  ;;  %s577_s1 = int_to_ptr.hbm [resolvable:$true] %s576_s1  ;;  %s605_s24 = int_to_ptr.hbm [resolvable:$true] %s604_s24 }
  0x20   : > { %2344 = dma.hbm_to_vmem [thread:$0]  (!%p2905_p5), %s543_s12, 32, %s545_s28, [#allocation5], %s2753_s3, %s2753_s3, %s2754_s27  }
  0x21   : > { %s511_s9 = sshll.u32 %s3354_s22, 4  ;;  %s2759_s4 = smov [#allocation12]   ;;  %s512_s9 = int_to_ptr.hbm [resolvable:$true] %s511_s9 }
  0x22   : > { %2338 = dma.hbm_to_vmem [thread:$0]  (!%p2905_p5), %s512_s9, 16, %s514_s0, [#allocation3]  }
  0x23   : > { %s2758_s9 = smov [#allocation9]   ;;  %s606_s0 = sshll.u32 %s2759_s4, 4  ;;  %s607_s0 = int_to_ptr.vmem [resolvable:$true] %s606_s0 }
  0x24   : > { %s578_s26 = sshll.u32 %s2758_s9, 4  ;;  %s618_s12 = sshll.u32 %s3323_s14, 4  ;;  %s579_s26 = int_to_ptr.vmem [resolvable:$true] %s578_s26  ;;  %s619_s12 = int_to_ptr.hbm [resolvable:$true] %s618_s12 }
  0x25   : > { %2350 = dma.hbm_to_vmem [thread:$0]  (!%p2905_p5), %s577_s1, 32, %s579_s26, [#allocation8], %s2753_s3, %s2753_s3, %s2754_s27  }
  0x26   : > { %2356 = dma.hbm_to_vmem [thread:$0]  (!%p2905_p5), %s605_s24, 32, %s607_s0, [#allocation11], %s2753_s3, %s2753_s3, %s2754_s27  }
  0x27   : > { %s2760_s28 = smov [#allocation13]   ;;  %666 = sbr.rel (%p2894_p3) target bundleno = 5650 (0x1612), region = 100 }
  0x28   : > { %s620_s22 = sshll.u32 %s2760_s28, 4  ;;  %s621_s22 = int_to_ptr.vmem [resolvable:$true] %s620_s22 }
  0x29   : > { %2359 = dma.hbm_to_vmem [thread:$0]  (!%p2905_p5), %s619_s12, 32, %s621_s22, [#allocation14], %s2753_s3, %s2753_s3, %s2754_s27  }
  0x2c   : > { %2728 = dma.done.wait (%p2360_p2), [#allocation3], 16  }
  0x2d   : > { %2730 = vsyncadd (%p2360_p2), [#allocation3], 4294967280 }
  0x2e   : > { %2732 = dma.done.wait (%p2360_p2), [#allocation5], 64  }
  0x2f   : > { %2734 = vsyncadd (%p2360_p2), [#allocation5], 4294967232 }
  0x30   : > { %2736 = dma.done.wait (%p2360_p2), [#allocation8], 64  }
  0x31   : > { %2738 = vsyncadd (%p2360_p2), [#allocation8], 4294967232 }
  0x32   : > { %2740 = dma.done.wait (%p2360_p2), [#allocation11], 64  }
  0x33   : > { %2742 = vsyncadd (%p2360_p2), [#allocation11], 4294967232 }
  0x34   : > { %2744 = dma.done.wait (%p2360_p2), [#allocation14], 32  }
  0x35   : > { %2746 = vsyncadd (%p2360_p2), [#allocation14], 4294967264  ;;  %p763_p6 = scmp.lt.s32.totalorder %s2889_s2, 1  ;;  %s3355_s3 = sld [smem:[#allocation22_spill]]  ;;  %vm824_vm0 = vcmask 129024   ;;  %v2761_v2 = vmov 16.0   ;;  %v835_v24 = vlaneseq }
  0x36   : > { %2429 = vrcp.f32 %v2761_v2  ;;  %s3356_s24 = sld [smem:[#allocation23_spill]]  ;;  %vm859_vm6 = vcmask 130048   ;;  %v2410_v34 = vld [vmem:[#allocation2] ss:$0 sm:$0xff]  ;;  %vm896_vm7 = vcmask 261120   ;;  %s2764_s23 = smov 96  }
  0x37   : > { %s3368_s2 = smov (!%p763_p6, %s2889_s2), 1  ;;  %s3357_s5 = sld [smem:[#allocation25_spill]]  ;;  %v836_v27 = vshrl.u32 %v835_v24, 7  ;;  %v2411_v37 = vld [vmem:[#allocation4] ss:$0 sm:$0xff]  ;;  %vm967_vm8 = vcmask 1046528  }
  0x38   : > { %s3333_s1 = sshll.u32 %s3368_s2, 3  ;;  %vm923_vm9 = vcmask 64512   ;;  %vm949_vm10 = vcmask 55296   ;;  %s3336_s30 = smov 56   ;;  %vm963_vm11 = vcmask 56320   ;;  %vm1292_vm12 = vcmask 260096  }
  0x39   : > { %vm837_vm5 = vcmp.lt.s32.totalorder %v836_v27, 4  ;;  %s3339_s9 = smov 80   ;;  %s2767_s26 = smov 104  }
  0x3a   : > { %s2768_s4 = smov 120   ;;  %s3337_s0 = smov 112  }
  0x3b   : > { %s771_s27 = scalar_lea.vmem %s3355_s3, %s3333_s1  ;;  %s2762_s3 = smov 88  }
  0x3c   : > { %v778_v0 = vld [vmem:[%s771_s27] sm:$0x7f]  ;;  %v2430_v3 = vpop.eup %2429  ;;  %v854_v14 = vld [vmem:[%s3356_s24 + $0x8] sm:$0xff]  ;;  %s2763_s27 = smov 64   ;;  %s3338_s21 = smov 72  }
  0x3d   : > { %v825_v1 = vsel %vm824_vm0, %v778_v0, 0.0  ;;  %v790_v4 = vmul.f32 16.0, %v2430_v3  ;;  %vm794_vm1 = vweird.f32 %v2430_v3  ;;  %v853_v15 = vld [vmem:[%s3356_s24] sm:$0xff]  ;;  %877 = vmatpush.msra.mxu0 %v854_v14  ;;  %v886_v16 = vld [vmem:[%s3357_s5 + $0x18] sm:$0xff]  ;;  %v885_v17 = vld [vmem:[%s3357_s5 + $0x10] sm:$0xff]  ;;  %s3335_s29 = smov 48  }
  0x3e   : > { %826 = vadd.xlane.f32.xlu0 %v825_v1  ;;  %v884_v32 = vld [vmem:[%s3357_s5 + $0x8] sm:$0xff]  ;;  %v883_v33 = vld [vmem:[%s3357_s5] sm:$0xff]  ;;  %s3334_s12 = smov 40   ;;  %s3365_s25 = sshll.u32 %s3368_s2, 3 }
  0x3f   : > { %v791_v5 = vsub.f32 1.0, %v790_v4  ;;  %878 = vmatpush.msra.mxu0 %v853_v15 }
  0x41   : > { %v792_v6 = vmul.f32 %v2430_v3, %v791_v5  ;;  %912 = vmatpush.msrb.mxu0 %v886_v16 }
  0x43   : > { %v793_v7 = vadd.f32 %v2430_v3, %v792_v6  ;;  %913 = vmatpush.msrb.mxu0 %v885_v17 }
  0x45   : > { %v2997_v8 = vsel %vm794_vm1, %v2430_v3, %v793_v7  ;;  %914 = vmatpush.msrb.mxu0 %v884_v32  ;;  %v888_v3 = vld [vmem:[%s3315_s6] sm:$0xff]  ;;  %vm1382_vm1 = vcmask 523264  }
  0x47   : > { %915 = vmatpush.msrb.mxu0 %v883_v33  ;;  %v890_v33 = vld [vmem:[%s3315_s6 + $0x10] sm:$0xff] }
  0xb1   : > { %v827_v9 = vpop.xlane.xlu0 %826 }
  0xb2   : > { %v828_v10 = vmul.f32 %v827_v9, %v2997_v8 }
  0xb4   : > { %v829_v11 = vsub.f32 %v778_v0, %v828_v10 }
  0xb6   : > { %v830_v12 = vmul.f32 %v829_v11, %v829_v11 }
  0xb8   : > { %v831_v13 = vsel %vm824_vm0, %v830_v12, 0.0 }
  0xb9   : > { %832 = vadd.xlane.f32.xlu0 %v831_v13  ;;  %v889_v13 = vld [vmem:[%s3315_s6 + $0x8] sm:$0xff] }
 0x12c   : > { %v833_v18 = vpop.xlane.xlu0 %832 }
 0x12d   : > { %v834_v19 = vmul.f32 %v833_v18, %v2997_v8 }
 0x12f   : > { %v838_v20 = vadd.f32 1e-05, %v834_v19 }
 0x131   : > { %2431 = vrsqrt.f32 %v838_v20  ;;  %vm845_vm3 = vweird.f32 %v838_v20 }
 0x137   : > { %v2432_v21 = vpop.eup %2431 }
 0x138   : > { %v840_v22 = vmul.f32 %v2432_v21, %v838_v20  ;;  %vm846_vm2 = vweird.f32 %v2432_v21 }
 0x139   : > { %vm847_vm4 = vmor %vm845_vm3, %vm846_vm2 }
 0x13a   : > { %v841_v23 = vmul.f32 %v2432_v21, %v840_v22 }
 0x13c   : > { %v842_v25 = vmul.f32 0.5, %v841_v23 }
 0x13e   : > { %v843_v26 = vsub.f32 1.5, %v842_v25 }
 0x140   : > { %v844_v28 = vmul.f32 %v2432_v21, %v843_v26 }
 0x142   : > { %v848_v29 = vsel %vm847_vm4, %v2432_v21, %v844_v28 }
 0x143   : > { %v849_v30 = vmul.f32 %v848_v29, %v829_v11 }
 0x145   : > { %v852_v31 = vsel %vm837_vm5, %v849_v30, %v778_v0 }
 0x146   : > { %2230 = vmatmul.msk.f32.vlgmr.msra.gmra.mxu0 %vm859_vm6, %v852_v31 }
 0x1c3   : > { %v880_v35 = vpop.f32.mrf.mxu0 }
 0x1c4   : > { %v3020_v36 = vadd.f32 %v2410_v34, %v880_v35 }
 0x1c6   : > { %2231 = vmatmul.msk.f32.vlgmr.msrb.gmra.mxu0 %vm896_vm7, %v3020_v36 }
 0x243   : > { %v917_v38 = vpop.f32.mrf.mxu0 }
 0x244   : > { %v3024_v39 = vadd.f32 %v2411_v37, %v917_v38 }
 0x246   : > { %992 = vrot.lane.b32.xlu0 %v3024_v39, %s2762_s3  ;;  %961 = vrot.lane.b32.xlu2 %v3024_v39, %s2763_s27 }
 0x247   : > { %921 = vrot.lane.b32.xlu1 %v3024_v39, %s2764_s23 }
 0x2a0   : > { %v962_v40 = vpop.permute.xlu2 %961 }
 0x2a1   : > { %2234 = vmatpush.msk.msra.mxu3 %vm967_vm8, %v962_v40 }
 0x2b8   : > { %v993_v41 = vpop.permute.xlu0 %992 }
 0x2b9   : > { %v922_v42 = vpop.permute.xlu1 %921  ;;  %2236 = vmatpush.xpose.msk.msrb.mxu3 %vm923_vm9, %v993_v41 }
 0x2ba   : > { %2232 = vmatpush.xpose.msk.msra.mxu2 %vm923_vm9, %v922_v42 }
 0x2bd   : > { %2233 = vmatmul.msk.f32.vlgmr.msra.gmra.mxu2 %vm923_vm9, %v3024_v39 }
 0x2be   : > { %1075 = vmatpush.msrb.mxu2 %v889_v13  ;;  %v2413_v13 = vld [vmem:[#allocation10] ss:$0 sm:$0xff] }
 0x2c0   : > { %1188 = vmatpush.msra.mxu2 %v890_v33 }
 0x340   : > { %v945_v43 = vpop.f32.mrf.mxu2 }
 0x341   : > { %v948_v44 = vmul.f32 0.35355338, %v945_v43 }
 0x343   : > { %v950_v45 = vsel %vm949_vm10, %v948_v44, -inf }
 0x344   : > { %951 = vmax.xlane.f32.xlu1 %v950_v45 }
 0x35d   : > { %1030 = vrot.lane.b32.xlu1 %v3024_v39, %s3336_s30  ;;  %s3363_s30 = smov 40  }
 0x365   : > { %1105 = vrot.lane.b32.xlu1 %v3024_v39, %s3339_s9  ;;  %s2302_s9 = sshll.u32 %s3368_s2, 4 }
 0x36d   : > { %1194 = vrot.lane.b32.xlu1 %v3024_v39, %s2767_s26 }
 0x3b7   : > { %v952_v46 = vpop.xlane.xlu1 %951 }
 0x3b8   : > { %v953_v47 = vsub.f32 %v948_v44, %v952_v46  ;;  %v2412_v46 = vld [vmem:[#allocation6] ss:$0 sm:$0xff] }
 0x3ba   : > { %v954_v48 = vmul.f32 1.442695, %v953_v47 }
 0x3bc   : > { %2433 = vpow2.f32 %v954_v48 }
 0x3c2   : > { %v2434_v49 = vpop.eup %2433 }
 0x3c3   : > { %v956_v50 = vsel %vm949_vm10, %v2434_v49, 0.0 }
 0x3c4   : > { %957 = vadd.xlane.f32.xlu2 %v956_v50 }
 0x3cf   : > { %v1031_v51 = vpop.permute.xlu1 %1030 }
 0x3d0   : > { %2238 = vmatpush.msk.msra.mxu1 %vm967_vm8, %v1031_v51 }
 0x3d2   : > { %1098 = vmatpush.msrb.mxu1 %v888_v3 }
 0x3d7   : > { %v1106_v55 = vpop.permute.xlu1 %1105 }
 0x3dc   : > { %990 = vrot.lane.b32.xlu2 %v3024_v39, %s2768_s4 }
 0x3df   : > { %v1195_v11 = vpop.permute.xlu1 %1194 }
 0x437   : > { %v958_v52 = vpop.xlane.xlu2 %957 }
 0x438   : > { %2435 = vrcp.f32 %v958_v52  ;;  %v2773_v52 = vmov 32.0  }
 0x43e   : > { %v2436_v53 = vpop.eup %2435 }
 0x43f   : > { %v960_v54 = vmul.f32 %v2436_v53, %v2434_v49  ;;  %v991_v56 = vpop.permute.xlu2 %990 }
 0x441   : > { %2235 = vmatmul.msk.f32.vlgmr.msra.gmra.mxu3 %vm963_vm11, %v960_v54 }
 0x442   : > { %2242 = vmatpush.xpose.msk.msra.mxu3 %vm923_vm9, %v1106_v55 }
 0x449   : > { %2237 = vmatmul.msk.f32.vlgmr.msrb.gmra.mxu3 %vm923_vm9, %v991_v56 }
 0x4c4   : > { %v987_v57 = vpop.f32.mrf.mxu3 }
 0x4cc   : > { %v1015_v58 = vpop.f32.mrf.mxu3 }
 0x4cd   : > { %v1018_v59 = vmul.f32 0.35355338, %v1015_v58 }
 0x4cf   : > { %v1019_v60 = vsel %vm949_vm10, %v1018_v59, -inf }
 0x4d0   : > { %1020 = vmax.xlane.f32.xlu0 %v1019_v60 }
 0x4e4   : > { %1103 = vrot.lane.b32.xlu0 %v3024_v39, %s3337_s0 }
 0x543   : > { %v1021_v61 = vpop.xlane.xlu0 %1020 }
 0x544   : > { %v1022_v62 = vsub.f32 %v1018_v59, %v1021_v61 }
 0x546   : > { %v1023_v63 = vmul.f32 1.442695, %v1022_v62 }
 0x548   : > { %2437 = vpow2.f32 %v1023_v63  ;;  %v1333_v63 = vld [vmem:[%s3317_s8 + $0x18] sm:$0xff] }
 0x54e   : > { %v2438_v0 = vpop.eup %2437 }
 0x54f   : > { %v1025_v1 = vsel %vm949_vm10, %v2438_v0, 0.0 }
 0x550   : > { %1026 = vadd.xlane.f32.xlu2 %v1025_v1  ;;  %v1331_v1 = vld [vmem:[%s3317_s8 + $0x8] sm:$0xff] }
 0x556   : > { %v1104_v2 = vpop.permute.xlu0 %1103 }
 0x557   : > { %2243 = vmatmul.msk.f32.vlgmr.msra.gmra.mxu3 %vm923_vm9, %v1104_v2  ;;  %v1330_v2 = vld [vmem:[%s3317_s8] sm:$0xff] }
 0x568   : > { %1196 = vrot.lane.b32.xlu2 %v3024_v39, %s3338_s21  ;;  %s3362_s21 = smov 48  }
 0x5c3   : > { %v1027_v4 = vpop.xlane.xlu2 %1026 }
 0x5c4   : > { %2439 = vrcp.f32 %v1027_v4 }
 0x5ca   : > { %v2440_v5 = vpop.eup %2439 }
 0x5cb   : > { %v1197_v6 = vpop.permute.xlu2 %1196  ;;  %v1029_v7 = vmul.f32 %v2440_v5, %v2438_v0  ;;  %v1332_v0 = vld [vmem:[%s3317_s8 + $0x10] sm:$0xff] }
 0x5cd   : > { %2239 = vmatmul.msk.f32.vlgmr.msra.gmra.mxu1 %vm963_vm11, %v1029_v7 }
 0x5ce   : > { %2247 = vmatpush.xpose.msk.msra.mxu1 %vm923_vm9, %v1197_v6 }
 0x5d5   : > { %2241 = vmatmul.msk.f32.vlgmr.msrb.gmra.mxu1 %vm923_vm9, %v987_v57 }
 0x5da   : > { %v1128_v9 = vpop.f32.mrf.mxu3 }
 0x5db   : > { %v1131_v10 = vmul.f32 0.35355338, %v1128_v9 }
 0x5dd   : > { %2248 = vmatmul.msk.f32.vlgmr.msra.gmra.mxu1 %vm923_vm9, %v1195_v11  ;;  %v1132_v12 = vsel %vm949_vm10, %v1131_v10, -inf }
 0x5de   : > { %1133 = vmax.xlane.f32.xlu1 %v1132_v12 }
 0x64a   : > { %v1054_v14 = vpop.f32.mrf.mxu1 }
 0x64b   : > { %2240 = vmatmul.msk.f32.vlgmr.msrb.gmra.mxu2 %vm923_vm9, %v1054_v14 }
 0x64c   : > { %1353 = vmatpush.msrb.mxu2 %v1333_v63  ;;  %v2417_v63 = vld [vmem:[#allocation13] ss:$0 sm:$0xff] }
 0x64e   : > { %1354 = vmatpush.msrb.mxu2 %v1332_v0 }
 0x650   : > { %1355 = vmatpush.msrb.mxu2 %v1331_v1 }
 0x651   : > { %v1134_v15 = vpop.xlane.xlu1 %1133 }
 0x652   : > { %v1135_v16 = vsub.f32 %v1131_v10, %v1134_v15  ;;  %v1100_v17 = vpop.f32.mrf.mxu1  ;;  %1356 = vmatpush.msrb.mxu2 %v1330_v2  ;;  %v2418_v2 = vld [vmem:[%s3324_s15] ss:$0 sm:$0xff] }
 0x654   : > { %v1136_v18 = vmul.f32 1.442695, %v1135_v16  ;;  %v2414_v16 = vld [vmem:[#allocation12] ss:$0 sm:$0xff] }
 0x656   : > { %2441 = vpow2.f32 %v1136_v18 }
 0x65a   : > { %v1219_v19 = vpop.f32.mrf.mxu1 }
 0x65b   : > { %v1222_v20 = vmul.f32 0.35355338, %v1219_v19  ;;  %v1377_v19 = vld [vmem:[%s3319_s10 + $0x38] sm:$0xff] }
 0x65c   : > { %v2442_v21 = vpop.eup %2441  ;;  %1394 = vmatpush.msrb.mxu1 %v1377_v19 }
 0x65d   : > { %v1223_v22 = vsel %vm949_vm10, %v1222_v20, -inf  ;;  %v1138_v23 = vsel %vm949_vm10, %v2442_v21, 0.0 }
 0x65e   : > { %1224 = vmax.xlane.f32.xlu0 %v1223_v22  ;;  %1139 = vadd.xlane.f32.xlu2 %v1138_v23  ;;  %v1374_v22 = vld [vmem:[%s3319_s10 + $0x20] sm:$0xff]  ;;  %v1373_v23 = vld [vmem:[%s3319_s10 + $0x18] sm:$0xff] }
 0x672   : > { %1143 = vrot.lane.b32.xlu0 %v3024_v39, %s3335_s29  ;;  %s775_s29 = scalar_lea.vmem %s3329_s20, %s3365_s25 }
 0x6ce   : > { %v1077_v42 = vpop.f32.mrf.mxu2 }
 0x6cf   : > { %v1101_v44 = vadd.f32 %v1100_v17, %v1077_v42 }
 0x6d1   : > { %v1225_v24 = vpop.xlane.xlu0 %1224  ;;  %v1140_v27 = vpop.xlane.xlu2 %1139 }
 0x6d2   : > { %v1226_v25 = vsub.f32 %v1222_v20, %v1225_v24  ;;  %v1376_v20 = vld [vmem:[%s3319_s10 + $0x30] sm:$0xff] }
 0x6d3   : > { %1395 = vmatpush.msrb.mxu1 %v1376_v20  ;;  %v1372_v24 = vld [vmem:[%s3319_s10 + $0x10] sm:$0xff] }
 0x6d4   : > { %v1227_v26 = vmul.f32 1.442695, %v1226_v25  ;;  %v1371_v25 = vld [vmem:[%s3319_s10 + $0x8] sm:$0xff] }
 0x6d6   : > { %2443 = vpow2.f32 %v1227_v26  ;;  %v1370_v26 = vld [vmem:[%s3319_s10] sm:$0xff] }
 0x6d7   : > { %2445 = vrcp.f32 %v1140_v27  ;;  %v2415_v27 = vld [vmem:[#allocation7] ss:$0 sm:$0xff] }
 0x6dc   : > { %v2444_v28 = vpop.eup %2443 }
 0x6dd   : > { %v1229_v29 = vsel %vm949_vm10, %v2444_v28, 0.0  ;;  %v2446_v30 = vpop.eup %2445 }
 0x6de   : > { %1230 = vadd.xlane.f32.xlu1 %v1229_v29  ;;  %v1142_v31 = vmul.f32 %v2446_v30, %v2442_v21  ;;  %v1375_v21 = vld [vmem:[%s3319_s10 + $0x28] sm:$0xff] }
 0x6df   : > { %1396 = vmatpush.msrb.mxu1 %v1375_v21 }
 0x6e1   : > { %1397 = vmatpush.msrb.mxu1 %v1374_v22 }
 0x6e3   : > { %1398 = vmatpush.msrb.mxu1 %v1373_v23 }
 0x6e4   : > { %v1144_v32 = vpop.permute.xlu0 %1143 }
 0x6e5   : > { %2244 = vmatpush.msk.msra.mxu0 %vm967_vm8, %v1144_v32  ;;  %1399 = vmatpush.msrb.mxu1 %v1372_v24 }
 0x6e6   : > { %2245 = vmatmul.msk.f32.vlgmr.msra.gmra.mxu0 %vm963_vm11, %v1142_v31 }
 0x6e7   : > { %1400 = vmatpush.msrb.mxu1 %v1371_v25 }
 0x6e9   : > { %1401 = vmatpush.msrb.mxu1 %v1370_v26 }
 0x6f7   : > { %1234 = vrot.lane.b32.xlu1 %v3024_v39, %s3334_s12  ;;  %v891_v39 = vld [vmem:[%s3315_s6 + $0x18] sm:$0xff] }
 0x6f8   : > { %1279 = vmatpush.msrb.mxu0 %v891_v39  ;;  %v2416_v39 = vld [vmem:[#allocation9] ss:$0 sm:$0xff] }
 0x751   : > { %v1231_v34 = vpop.xlane.xlu1 %1230 }
 0x752   : > { %2447 = vrcp.f32 %v1231_v34 }
 0x753   : > { %2449 = vrcp.f32 %v2773_v52  ;;  %v2255_v52 = vld [vmem:[%s3357_s5 + $0x28] sm:$0xff] }
 0x758   : > { %v2448_v37 = vpop.eup %2447 }
 0x759   : > { %v1233_v38 = vmul.f32 %v2448_v37, %v2444_v28  ;;  %v2450_v53 = vpop.eup %2449 }
 0x75a   : > { %v1297_v54 = vmul.f32 32.0, %v2450_v53  ;;  %vm1301_vm13 = vweird.f32 %v2450_v53 }
 0x75c   : > { %v1298_v55 = vsub.f32 1.0, %v1297_v54 }
 0x75e   : > { %v1299_v56 = vmul.f32 %v2450_v53, %v1298_v55 }
 0x760   : > { %v1300_v57 = vadd.f32 %v2450_v53, %v1299_v56 }
 0x762   : > { %v3091_v58 = vsel %vm1301_vm13, %v2450_v53, %v1300_v57  ;;  %v2254_v53 = vld [vmem:[%s3357_s5 + $0x20] sm:$0xff] }
 0x763   : > { %v1167_v35 = vpop.f32.mrf.mxu0 }
 0x764   : > { %2246 = vmatmul.msk.f32.vlgmr.msra.gmra.mxu2 %vm923_vm9, %v1167_v35 }
 0x769   : > { %v1235_v40 = vpop.permute.xlu1 %1234 }
 0x76a   : > { %2249 = vmatpush.msk.msrb.mxu3 %vm967_vm8, %v1235_v40 }
 0x76b   : > { %2250 = vmatmul.msk.f32.vlgmr.msrb.gmra.mxu3 %vm963_vm11, %v1233_v38 }
 0x7e7   : > { %v1190_v43 = vpop.f32.mrf.mxu2 }
 0x7e8   : > { %v1193_v45 = vadd.f32 %v1190_v43, %v1101_v44 }
 0x7ee   : > { %v1258_v41 = vpop.f32.mrf.mxu3 }
 0x7ef   : > { %2251 = vmatmul.msk.f32.vlgmr.msrb.gmra.mxu0 %vm923_vm9, %v1258_v41 }
 0x86c   : > { %v1281_v47 = vpop.f32.mrf.mxu0 }
 0x86d   : > { %v1284_v48 = vadd.f32 %v1281_v47, %v1193_v45 }
 0x86f   : > { %v1288_v49 = vadd.f32 %v2412_v46, %v1284_v48 }
 0x871   : > { %v1289_v50 = vadd.f32 %v1288_v49, %v3020_v36 }
 0x873   : > { %v1293_v51 = vsel %vm1292_vm12, %v1289_v50, 0.0 }
 0x874   : > { %1294 = vadd.xlane.f32.xlu2 %v1293_v51  ;;  %v2256_v51 = vld [vmem:[%s3357_s5 + $0x30] sm:$0xff] }
 0x8e7   : > { %v1295_v59 = vpop.xlane.xlu2 %1294 }
 0x8e8   : > { %v1303_v60 = vmul.f32 %v3091_v58, %v1295_v59 }
 0x8ea   : > { %v1304_v61 = vsub.f32 %v1289_v50, %v1303_v60  ;;  %v2257_v50 = vld [vmem:[%s3357_s5 + $0x38] sm:$0xff] }
 0x8eb   : > { %1471 = vmatpush.msra.mxu3 %v2257_v50 }
 0x8ec   : > { %v1305_v62 = vmul.f32 %v1304_v61, %v1304_v61 }
 0x8ed   : > { %1472 = vmatpush.msra.mxu3 %v2256_v51 }
 0x8ee   : > { %v1306_v36 = vsel %vm1292_vm12, %v1305_v62, 0.0 }
 0x8ef   : > { %1307 = vadd.xlane.f32.xlu2 %v1306_v36  ;;  %1473 = vmatpush.msra.mxu3 %v2255_v52 }
 0x8f1   : > { %1474 = vmatpush.msra.mxu3 %v2254_v53 }
 0x962   : > { %v1308_v3 = vpop.xlane.xlu2 %1307 }
 0x963   : > { %v1309_v4 = vmul.f32 %v1308_v3, %v3091_v58 }
 0x965   : > { %v1310_v5 = vadd.f32 1e-05, %v1309_v4 }
 0x967   : > { %2451 = vrsqrt.f32 %v1310_v5  ;;  %vm1317_vm15 = vweird.f32 %v1310_v5 }
 0x96d   : > { %v2452_v6 = vpop.eup %2451 }
 0x96e   : > { %v1312_v7 = vmul.f32 %v2452_v6, %v1310_v5  ;;  %vm1318_vm14 = vweird.f32 %v2452_v6  ;;  %v2419_v5 = vld [vmem:[#allocation4 + $0x1] ss:$0 sm:$0xff] }
 0x96f   : > { %vm1319_vm0 = vmor %vm1317_vm15, %vm1318_vm14  ;;  %vm779_vm15 = vcmask 31744  }
 0x970   : > { %v1313_v9 = vmul.f32 %v2452_v6, %v1312_v7 }
 0x972   : > { %v1314_v10 = vmul.f32 0.5, %v1313_v9 }
 0x974   : > { %v1315_v11 = vsub.f32 1.5, %v1314_v10 }
 0x976   : > { %v1316_v12 = vmul.f32 %v2452_v6, %v1315_v11 }
 0x978   : > { %v1320_v14 = vsel %vm1319_vm0, %v2452_v6, %v1316_v12 }
 0x979   : > { %v1321_v15 = vmul.f32 %v1320_v14, %v1304_v61  ;;  %v2258_v14 = vld [vmem:[%s3315_s6 + $0x20] sm:$0xff] }
 0x97a   : > { %1653 = vmatpush.msra.mxu1 %v2258_v14 }
 0x97b   : > { %v1325_v17 = vmul.f32 %v2413_v13, %v1321_v15 }
 0x97d   : > { %v1329_v18 = vadd.f32 %v2414_v16, %v1325_v17 }
 0x97f   : > { %2252 = vmatmul.msk.f32.vlgmr.msrb.gmra.mxu2 %vm896_vm7, %v1329_v18 }
 0xa02   : > { %v1358_v28 = vpop.f32.mrf.mxu2 }
 0xa03   : > { %v1359_v29 = vadd.f32 %v2415_v27, %v1358_v28 }
 0xa05   : > { %v1361_v30 = vmul.f32 %v1359_v29, %v1359_v29 }
 0xa07   : > { %v1362_v31 = vmul.f32 %v1361_v30, %v1359_v29 }
 0xa09   : > { %v1363_v32 = vmul.f32 0.044715, %v1362_v31 }
 0xa0b   : > { %v1364_v33 = vadd.f32 %v1363_v32, %v1359_v29 }
 0xa0d   : > { %v1365_v34 = vmul.f32 0.7978846, %v1364_v33 }
 0xa0f   : > { %2453 = vtanh.f32 %v1365_v34 }
 0xa15   : > { %v2454_v35 = vpop.eup %2453 }
 0xa16   : > { %v1367_v37 = vadd.f32 1.0, %v2454_v35 }
 0xa18   : > { %v1368_v38 = vmul.f32 0.5, %v1367_v37 }
 0xa1a   : > { %v1369_v40 = vmul.f32 %v1368_v38, %v1359_v29 }
 0xa1c   : > { %2253 = vmatmul.msk.f32.vlgmr.msrb.gmra.mxu1 %vm1382_vm1, %v1369_v40 }
 0xa99   : > { %v1403_v41 = vpop.f32.mrf.mxu1 }
 0xa9a   : > { %v1404_v42 = vadd.f32 %v2416_v39, %v1403_v41 }
 0xa9c   : > { %v1406_v43 = vadd.f32 %v1404_v42, %v1329_v18 }
 0xa9e   : > { %v1409_v44 = vsel %vm1292_vm12, %v1406_v43, 0.0 }
 0xa9f   : > { %1410 = vadd.xlane.f32.xlu0 %v1409_v44 }
 0xb12   : > { %v1411_v45 = vpop.xlane.xlu0 %1410 }
 0xb13   : > { %v1412_v46 = vmul.f32 %v1411_v45, %v3091_v58 }
 0xb15   : > { %v1413_v47 = vsub.f32 %v1406_v43, %v1412_v46 }
 0xb17   : > { %v1414_v48 = vmul.f32 %v1413_v47, %v1413_v47 }
 0xb19   : > { %v1415_v49 = vsel %vm1292_vm12, %v1414_v48, 0.0 }
 0xb1a   : > { %1416 = vadd.xlane.f32.xlu2 %v1415_v49 }
 0xb8d   : > { %v1417_v54 = vpop.xlane.xlu2 %1416 }
 0xb8e   : > { %v1418_v55 = vmul.f32 %v1417_v54, %v3091_v58 }
 0xb90   : > { %v1419_v56 = vadd.f32 1e-05, %v1418_v55  ;;  %v2259_v55 = vld [vmem:[%s3315_s6 + $0x28] sm:$0xff] }
 0xb92   : > { %2455 = vrsqrt.f32 %v1419_v56  ;;  %vm1426_vm3 = vweird.f32 %v1419_v56 }
 0xb98   : > { %v2456_v57 = vpop.eup %2455 }
 0xb99   : > { %v1421_v59 = vmul.f32 %v2456_v57, %v1419_v56  ;;  %vm1427_vm2 = vweird.f32 %v2456_v57 }
 0xb9a   : > { %vm1428_vm4 = vmor %vm1426_vm3, %vm1427_vm2 }
 0xb9b   : > { %v1422_v60 = vmul.f32 %v2456_v57, %v1421_v59 }
 0xb9d   : > { %v1423_v61 = vmul.f32 0.5, %v1422_v60 }
 0xb9f   : > { %v1424_v62 = vsub.f32 1.5, %v1423_v61 }
 0xba1   : > { %v1425_v36 = vmul.f32 %v2456_v57, %v1424_v62 }
 0xba3   : > { %v1429_v0 = vsel %vm1428_vm4, %v2456_v57, %v1425_v36 }
 0xba4   : > { %v1430_v1 = vmul.f32 %v1429_v0, %v1413_v47 }
 0xba6   : > { %v1434_v3 = vmul.f32 %v2417_v63, %v1430_v1 }
 0xba8   : > { %v3153_v4 = vadd.f32 %v2418_v2, %v1434_v3  ;;  %v2260_v2 = vld [vmem:[%s3315_s6 + $0x30] sm:$0xff] }
 0xbaa   : > { %2262 = vmatmul.msk.f32.vlgmr.msra.gmra.mxu3 %vm896_vm7, %v3153_v4 }
 0xc2d   : > { %v1476_v6 = vpop.f32.mrf.mxu3 }
 0xc2e   : > { %v3157_v7 = vadd.f32 %v2419_v5, %v1476_v6 }
 0xc30   : > { %1547 = vrot.lane.b32.xlu0 %v3157_v7, %s2762_s3  ;;  %1480 = vrot.lane.b32.xlu1 %v3157_v7, %s2764_s23  ;;  %s3358_s3 = smov 80   ;;  %s3359_s23 = smov 72  }
 0xc38   : > { %1749 = vrot.lane.b32.xlu0 %v3157_v7, %s2767_s26 }
 0xca2   : > { %v1548_v9 = vpop.permute.xlu0 %1547  ;;  %v1481_v10 = vpop.permute.xlu1 %1480 }
 0xca3   : > { %2263 = vmatpush.xpose.msk.msra.mxu0 %vm923_vm9, %v1481_v10  ;;  %2267 = vmatpush.xpose.msk.msrb.mxu3 %vm923_vm9, %v1548_v9 }
 0xca6   : > { %2264 = vmatmul.msk.f32.vlgmr.msra.gmra.mxu0 %vm923_vm9, %v3157_v7 }
 0xcaa   : > { %v1750_v35 = vpop.permute.xlu0 %1749 }
 0xd23   : > { %v1503_v11 = vpop.f32.mrf.mxu0 }
 0xd24   : > { %v1506_v12 = vmul.f32 0.35355338, %v1503_v11 }
 0xd26   : > { %v1507_v13 = vsel %vm949_vm10, %v1506_v12, -inf }
 0xd27   : > { %1508 = vmax.xlane.f32.xlu2 %v1507_v13 }
 0xd3f   : > { %1518 = vrot.lane.b32.xlu2 %v3157_v7, %s2763_s27  ;;  %s3360_s27 = smov 112  }
 0xd47   : > { %1545 = vrot.lane.b32.xlu2 %v3157_v7, %s2768_s4  ;;  %s3361_s4 = smov 56  }
 0xd4f   : > { %1660 = vrot.lane.b32.xlu2 %v3157_v7, %s3358_s3 }
 0xd57   : > { %1751 = vrot.lane.b32.xlu2 %v3157_v7, %s3359_s23 }
 0xd9a   : > { %v1509_v15 = vpop.xlane.xlu2 %1508 }
 0xd9b   : > { %v1510_v16 = vsub.f32 %v1506_v12, %v1509_v15 }
 0xd9d   : > { %v1511_v17 = vmul.f32 1.442695, %v1510_v16  ;;  %v2420_v16 = vld [vmem:[#allocation6 + $0x1] ss:$0 sm:$0xff] }
 0xd9f   : > { %2457 = vpow2.f32 %v1511_v17 }
 0xda2   : > { %v1519_v18 = vpop.permute.xlu2 %1518 }
 0xda3   : > { %2265 = vmatpush.msk.msra.mxu2 %vm967_vm8, %v1519_v18 }
 0xda5   : > { %v2458_v19 = vpop.eup %2457  ;;  %1630 = vmatpush.msrb.mxu2 %v2259_v55 }
 0xda6   : > { %v1513_v20 = vsel %vm949_vm10, %v2458_v19, 0.0 }
 0xda7   : > { %1514 = vadd.xlane.f32.xlu1 %v1513_v20 }
 0xdaa   : > { %v1546_v21 = vpop.permute.xlu2 %1545 }
 0xdab   : > { %2268 = vmatmul.msk.f32.vlgmr.msrb.gmra.mxu3 %vm923_vm9, %v1546_v21 }
 0xdb2   : > { %v1661_v22 = vpop.permute.xlu2 %1660 }
 0xdb3   : > { %2273 = vmatpush.xpose.msk.msra.mxu3 %vm923_vm9, %v1661_v22 }
 0xdba   : > { %v1752_v23 = vpop.permute.xlu2 %1751 }
 0xdbb   : > { %2278 = vmatpush.xpose.msk.msrb.mxu1 %vm923_vm9, %v1752_v23 }
 0xdc0   : > { %1658 = vrot.lane.b32.xlu1 %v3157_v7, %s3360_s27 }
 0xe1a   : > { %v1515_v24 = vpop.xlane.xlu1 %1514 }
 0xe1b   : > { %2459 = vrcp.f32 %v1515_v24 }
 0xe21   : > { %v2460_v25 = vpop.eup %2459 }
 0xe22   : > { %v1517_v26 = vmul.f32 %v2460_v25, %v2458_v19 }
 0xe24   : > { %2266 = vmatmul.msk.f32.vlgmr.msra.gmra.mxu2 %vm963_vm11, %v1517_v26 }
 0xe25   : > { %1743 = vmatpush.msra.mxu2 %v2260_v2  ;;  %v2424_v2 = vld [vmem:[#allocation9 + $0x1] ss:$0 sm:$0xff] }
 0xe2e   : > { %v1570_v27 = vpop.f32.mrf.mxu3 }
 0xe2f   : > { %v1573_v28 = vmul.f32 0.35355338, %v1570_v27  ;;  %v2286_v27 = vld [vmem:[%s3317_s8 + $0x38] sm:$0xff] }
 0xe31   : > { %v1574_v29 = vsel %vm949_vm10, %v1573_v28, -inf }
 0xe32   : > { %v1659_v30 = vpop.permute.xlu1 %1658  ;;  %1575 = vmax.xlane.f32.xlu2 %v1574_v29  ;;  %v2283_v29 = vld [vmem:[%s3317_s8 + $0x20] sm:$0xff] }
 0xe33   : > { %2274 = vmatmul.msk.f32.vlgmr.msra.gmra.mxu3 %vm923_vm9, %v1659_v30 }
 0xea5   : > { %v1576_v31 = vpop.xlane.xlu2 %1575 }
 0xea6   : > { %v1577_v32 = vsub.f32 %v1573_v28, %v1576_v31  ;;  %v2284_v28 = vld [vmem:[%s3317_s8 + $0x28] sm:$0xff] }
 0xea7   : > { %v1542_v33 = vpop.f32.mrf.mxu2 }
 0xea8   : > { %v1578_v34 = vmul.f32 1.442695, %v1577_v32  ;;  %2272 = vmatmul.msk.f32.vlgmr.msra.gmra.mxu1 %vm923_vm9, %v1542_v33 }
 0xeaa   : > { %2461 = vpow2.f32 %v1578_v34 }
 0xeb0   : > { %v2462_v37 = vpop.eup %2461  ;;  %2279 = vmatmul.msk.f32.vlgmr.msrb.gmra.mxu1 %vm923_vm9, %v1750_v35 }
 0xeb1   : > { %v1580_v38 = vsel %vm949_vm10, %v2462_v37, 0.0 }
 0xeb2   : > { %1581 = vadd.xlane.f32.xlu2 %v1580_v38 }
 0xeb6   : > { %v1683_v40 = vpop.f32.mrf.mxu3 }
 0xeb7   : > { %v1686_v39 = vmul.f32 0.35355338, %v1683_v40 }
 0xeb9   : > { %v1687_v41 = vsel %vm949_vm10, %v1686_v39, -inf }
 0xeba   : > { %1688 = vmax.xlane.f32.xlu0 %v1687_v41 }
 0xeca   : > { %1585 = vrot.lane.b32.xlu2 %v3157_v7, %s3361_s4 }
 0xf25   : > { %v1655_v42 = vpop.f32.mrf.mxu1  ;;  %v1582_v43 = vpop.xlane.xlu2 %1581 }
 0xf26   : > { %2463 = vrcp.f32 %v1582_v43  ;;  %v2422_v43 = vld [vmem:[#allocation12 + $0x1] ss:$0 sm:$0xff] }
 0xf2c   : > { %v2464_v44 = vpop.eup %2463 }
 0xf2d   : > { %v1584_v45 = vmul.f32 %v2464_v44, %v2462_v37  ;;  %v1689_v46 = vpop.xlane.xlu0 %1688  ;;  %v1774_v47 = vpop.f32.mrf.mxu1 }
 0xf2e   : > { %v1690_v48 = vsub.f32 %v1686_v39, %v1689_v46  ;;  %v1777_v49 = vmul.f32 0.35355338, %v1774_v47  ;;  %v1586_v50 = vpop.permute.xlu2 %1585  ;;  %v2421_v39 = vld [vmem:[#allocation10 + $0x1] ss:$0 sm:$0xff]  ;;  %v2295_v46 = vld [vmem:[%s3319_s10 + $0x78] sm:$0xff]  ;;  %v2294_v47 = vld [vmem:[%s3319_s10 + $0x70] sm:$0xff] }
 0xf2f   : > { %2269 = vmatpush.msk.msrb.mxu0 %vm967_vm8, %v1586_v50  ;;  %1946 = vmatpush.msra.mxu1 %v2295_v46  ;;  %v2291_v50 = vld [vmem:[%s3319_s10 + $0x58] sm:$0xff]  ;;  %v2427_v46 = vld [vmem:[%s3325_s16] ss:$0 sm:$0xff] }
 0xf30   : > { %v1691_v51 = vmul.f32 1.442695, %v1690_v48  ;;  %2270 = vmatmul.msk.f32.vlgmr.msrb.gmra.mxu0 %vm963_vm11, %v1584_v45  ;;  %v1778_v52 = vsel %vm949_vm10, %v1777_v49, -inf  ;;  %v2293_v48 = vld [vmem:[%s3319_s10 + $0x68] sm:$0xff] }
 0xf31   : > { %1779 = vmax.xlane.f32.xlu1 %v1778_v52  ;;  %1947 = vmatpush.msra.mxu1 %v2294_v47  ;;  %v2289_v52 = vld [vmem:[%s3319_s10 + $0x48] sm:$0xff] }
 0xf32   : > { %2465 = vpow2.f32 %v1691_v51  ;;  %v2290_v51 = vld [vmem:[%s3319_s10 + $0x50] sm:$0xff] }
 0xf33   : > { %1948 = vmatpush.msra.mxu1 %v2293_v48  ;;  %v2428_v48 = vld [vmem:[%s3326_s17] ss:$0 sm:$0xff] }
 0xf38   : > { %v2466_v53 = vpop.eup %2465 }
 0xf39   : > { %v1693_v54 = vsel %vm949_vm10, %v2466_v53, 0.0 }
 0xf3a   : > { %1694 = vadd.xlane.f32.xlu0 %v1693_v54  ;;  %v2423_v54 = vld [vmem:[#allocation7 + $0x1] ss:$0 sm:$0xff] }
 0xf4a   : > { %1698 = vrot.lane.b32.xlu1 %v3157_v7, %s3362_s21  ;;  %s3364_s21 = sld [smem:[#allocation21_spill]] }
 0xf50   : > { %s767_s22 = scalar_lea.vmem %s3364_s21, %s2302_s9 }
 0xfa4   : > { %v1780_v56 = vpop.xlane.xlu1 %1779 }
 0xfa5   : > { %v1781_v57 = vsub.f32 %v1777_v49, %v1780_v56  ;;  %v2292_v49 = vld [vmem:[%s3319_s10 + $0x60] sm:$0xff] }
 0xfa6   : > { %1949 = vmatpush.msra.mxu1 %v2292_v49 }
 0xfa7   : > { %v1782_v59 = vmul.f32 1.442695, %v1781_v57 }
 0xfa8   : > { %1950 = vmatpush.msra.mxu1 %v2291_v50 }
 0xfa9   : > { %2467 = vpow2.f32 %v1782_v59 }
 0xfaa   : > { %1951 = vmatpush.msra.mxu1 %v2290_v51  ;;  %v2025_v51 = vld [vmem:[%s3327_s18] sm:$0xff] }
 0xfac   : > { %1952 = vmatpush.msra.mxu1 %v2289_v52  ;;  %v776_v52 = vld [vmem:[%s767_s22] sm:$0xff] }
 0xfad   : > { %v1609_v60 = vpop.f32.mrf.mxu0  ;;  %v1695_v62 = vpop.xlane.xlu0 %1694 }
 0xfae   : > { %2271 = vmatmul.msk.f32.vlgmr.msrb.gmra.mxu2 %vm923_vm9, %v1609_v60  ;;  %2469 = vrcp.f32 %v1695_v62 }
 0xfaf   : > { %v2468_v61 = vpop.eup %2467  ;;  %1904 = vmatpush.msrb.mxu2 %v2286_v27 }
 0xfb0   : > { %v1784_v36 = vsel %vm949_vm10, %v2468_v61, 0.0 }
 0xfb1   : > { %1785 = vadd.xlane.f32.xlu0 %v1784_v36 }
 0xfb4   : > { %v2470_v63 = vpop.eup %2469 }
 0xfb5   : > { %v1697_v0 = vmul.f32 %v2470_v63, %v2466_v53  ;;  %v2288_v53 = vld [vmem:[%s3319_s10 + $0x40] sm:$0xff] }
 0xfb6   : > { %1953 = vmatpush.msra.mxu1 %v2288_v53  ;;  %v777_v53 = vld [vmem:[%s767_s22 + $0x8] sm:$0xff] }
 0xfbc   : > { %v1699_v1 = vpop.permute.xlu1 %1698 }
 0xfbd   : > { %2275 = vmatpush.msk.msra.mxu0 %vm967_vm8, %v1699_v1 }
 0xfbe   : > { %2276 = vmatmul.msk.f32.vlgmr.msra.gmra.mxu0 %vm963_vm11, %v1697_v0 }
 0xfc5   : > { %1789 = vrot.lane.b32.xlu0 %v3157_v7, %s3363_s30  ;;  %v2261_v7 = vld [vmem:[%s3315_s6 + $0x38] sm:$0xff] }
 0xfc6   : > { %1834 = vmatpush.msrb.mxu0 %v2261_v7 }
0x1024   : > { %v1786_v3 = vpop.xlane.xlu0 %1785 }
0x1025   : > { %2471 = vrcp.f32 %v1786_v3 }
0x102b   : > { %v2472_v5 = vpop.eup %2471 }
0x102c   : > { %v1788_v6 = vmul.f32 %v2472_v5, %v2468_v61 }
0x1031   : > { %v1632_v12 = vpop.f32.mrf.mxu2 }
0x1032   : > { %v1656_v14 = vadd.f32 %v1655_v42, %v1632_v12 }
0x1037   : > { %v1790_v9 = vpop.permute.xlu0 %1789 }
0x1038   : > { %2280 = vmatpush.msk.msrb.mxu3 %vm967_vm8, %v1790_v9 }
0x1039   : > { %2281 = vmatmul.msk.f32.vlgmr.msrb.gmra.mxu3 %vm963_vm11, %v1788_v6 }
0x103b   : > { %v1722_v10 = vpop.f32.mrf.mxu0 }
0x103c   : > { %2277 = vmatmul.msk.f32.vlgmr.msra.gmra.mxu2 %vm923_vm9, %v1722_v10 }
0x10bc   : > { %v1813_v11 = vpop.f32.mrf.mxu3 }
0x10bd   : > { %2282 = vmatmul.msk.f32.vlgmr.msrb.gmra.mxu0 %vm923_vm9, %v1813_v11 }
0x10bf   : > { %v1745_v13 = vpop.f32.mrf.mxu2 }
0x10c0   : > { %v1748_v15 = vadd.f32 %v1745_v13, %v1656_v14 }
0x113a   : > { %v1836_v17 = vpop.f32.mrf.mxu0 }
0x113b   : > { %v1839_v18 = vadd.f32 %v1836_v17, %v1748_v15 }
0x113d   : > { %v1843_v19 = vadd.f32 %v2420_v16, %v1839_v18 }
0x113f   : > { %v1844_v20 = vadd.f32 %v1843_v19, %v3153_v4  ;;  %v2285_v4 = vld [vmem:[%s3317_s8 + $0x30] sm:$0xff] }
0x1140   : > { %1905 = vmatpush.msrb.mxu2 %v2285_v4 }
0x1141   : > { %v1849_v21 = vsel %vm1292_vm12, %v1844_v20, 0.0 }
0x1142   : > { %1850 = vadd.xlane.f32.xlu2 %v1849_v21  ;;  %1906 = vmatpush.msrb.mxu2 %v2284_v28 }
0x1144   : > { %1907 = vmatpush.msrb.mxu2 %v2283_v29 }
0x11b5   : > { %v1851_v22 = vpop.xlane.xlu2 %1850 }
0x11b6   : > { %v1852_v23 = vmul.f32 %v1851_v22, %v3091_v58 }
0x11b8   : > { %v1853_v24 = vsub.f32 %v1844_v20, %v1852_v23  ;;  %v2425_v23 = vld [vmem:[#allocation13 + $0x1] ss:$0 sm:$0xff] }
0x11ba   : > { %v1854_v25 = vmul.f32 %v1853_v24, %v1853_v24 }
0x11bc   : > { %v1855_v26 = vsel %vm1292_vm12, %v1854_v25, 0.0 }
0x11bd   : > { %1856 = vadd.xlane.f32.xlu0 %v1855_v26  ;;  %v2426_v26 = vld [vmem:[%s3324_s15 + $0x1] ss:$0 sm:$0xff] }
0x1230   : > { %v1857_v30 = vpop.xlane.xlu0 %1856 }
0x1231   : > { %v1858_v31 = vmul.f32 %v1857_v30, %v3091_v58 }
0x1233   : > { %v1859_v32 = vadd.f32 1e-05, %v1858_v31 }
0x1235   : > { %2473 = vrsqrt.f32 %v1859_v32  ;;  %vm1866_vm6 = vweird.f32 %v1859_v32 }
0x123b   : > { %v2474_v33 = vpop.eup %2473 }
0x123c   : > { %v1861_v34 = vmul.f32 %v2474_v33, %v1859_v32  ;;  %vm1867_vm5 = vweird.f32 %v2474_v33 }
0x123d   : > { %vm1868_vm8 = vmor %vm1866_vm6, %vm1867_vm5 }
0x123e   : > { %v1862_v35 = vmul.f32 %v2474_v33, %v1861_v34 }
0x1240   : > { %v1863_v37 = vmul.f32 0.5, %v1862_v35  ;;  %v2026_v35 = vld [vmem:[%s3328_s19] sm:$0xff] }
0x1242   : > { %v1864_v38 = vsub.f32 1.5, %v1863_v37 }
0x1244   : > { %v1865_v40 = vmul.f32 %v2474_v33, %v1864_v38  ;;  %v2774_v38 = vmov 0  }
0x1245   : > { %2408 = vset.pattern.permute.xlu1 %v2774_v38  ;;  %2409 = vset.pattern.permute.xlu0 %v2774_v38 }
0x1246   : > { %v1869_v41 = vsel %vm1868_vm8, %v2474_v33, %v1865_v40 }
0x1247   : > { %v1870_v42 = vmul.f32 %v1869_v41, %v1853_v24 }
0x1249   : > { %v1874_v44 = vmul.f32 %v2421_v39, %v1870_v42 }
0x124b   : > { %v1878_v45 = vadd.f32 %v2422_v43, %v1874_v44 }
0x124d   : > { %2287 = vmatmul.msk.f32.vlgmr.msrb.gmra.mxu2 %vm896_vm7, %v1878_v45 }
0x12d0   : > { %v1909_v55 = vpop.f32.mrf.mxu2 }
0x12d1   : > { %v1910_v56 = vadd.f32 %v2423_v54, %v1909_v55  ;;  %v780_v54 = vsel %vm779_vm15, %v776_v52, 0.0  ;;  %v781_v55 = vsel %vm779_vm15, %v777_v53, 0.0 }
0x12d3   : > { %v1912_v57 = vmul.f32 %v1910_v56, %v1910_v56 }
0x12d5   : > { %v1913_v59 = vmul.f32 %v1912_v57, %v1910_v56 }
0x12d7   : > { %v1914_v60 = vmul.f32 0.044715, %v1913_v59 }
0x12d9   : > { %v1915_v61 = vadd.f32 %v1914_v60, %v1910_v56 }
0x12db   : > { %v1916_v62 = vmul.f32 0.7978846, %v1915_v61 }
0x12dd   : > { %2475 = vtanh.f32 %v1916_v62 }
0x12e3   : > { %v2476_v36 = vpop.eup %2475 }
0x12e4   : > { %v1918_v63 = vadd.f32 1.0, %v2476_v36 }
0x12e6   : > { %v1919_v0 = vmul.f32 0.5, %v1918_v63 }
0x12e8   : > { %v1920_v1 = vmul.f32 %v1919_v0, %v1910_v56  ;;  %v782_v56 = vadd.f32 %v781_v55, %v780_v54 }
0x12ea   : > { %2296 = vmatmul.msk.f32.vlgmr.msra.gmra.mxu1 %vm1382_vm1, %v1920_v1  ;;  %v783_v57 = vrot.slane %v782_v56, 4 }
0x12ec   : > { %v784_v59 = vadd.f32 %v783_v57, %v782_v56 }
0x12ee   : > { %v785_v60 = vrot.slane %v784_v59, 2 }
0x12f0   : > { %v786_v61 = vadd.f32 %v785_v60, %v784_v59 }
0x12f2   : > { %v787_v62 = vrot.slane %v786_v61, 1 }
0x12f4   : > { %v788_v36 = vadd.f32 %v787_v62, %v786_v61 }
0x12f6   : > { %v796_v63 = vmul.f32 %v2997_v8, %v788_v36 }
0x12f8   : > { %v797_v0 = vsub.f32 %v776_v52, %v796_v63  ;;  %v798_v1 = vsub.f32 %v777_v53, %v796_v63 }
0x1367   : > { %v1955_v3 = vpop.f32.mrf.mxu1 }
0x1368   : > { %v1956_v5 = vadd.f32 %v2424_v2, %v1955_v3  ;;  %v799_v2 = vmul.f32 %v797_v0, %v797_v0  ;;  %v800_v3 = vmul.f32 %v798_v1, %v798_v1 }
0x136a   : > { %v1958_v6 = vadd.f32 %v1956_v5, %v1878_v45  ;;  %v801_v5 = vsel %vm779_vm15, %v799_v2, 0.0 }
0x136c   : > { %v1963_v9 = vsel %vm1292_vm12, %v1958_v6, 0.0 }
0x136d   : > { %1964 = vadd.xlane.f32.xlu1 %v1963_v9 }
0x1386   : > { %2029 = vperm.xlu1 %2408, %v2026_v35  }
0x13e0   : > { %v1965_v10 = vpop.xlane.xlu1 %1964 }
0x13e1   : > { %v1966_v7 = vmul.f32 %v1965_v10, %v3091_v58 }
0x13e3   : > { %v1967_v11 = vsub.f32 %v1958_v6, %v1966_v7  ;;  %v802_v6 = vsel %vm779_vm15, %v800_v3, 0.0 }
0x13e4   : > { %v803_v9 = vadd.f32 %v802_v6, %v801_v5 }
0x13e5   : > { %v1968_v12 = vmul.f32 %v1967_v11, %v1967_v11 }
0x13e6   : > { %v804_v10 = vrot.slane %v803_v9, 4 }
0x13e7   : > { %v1969_v13 = vsel %vm1292_vm12, %v1968_v12, 0.0 }
0x13e8   : > { %1970 = vadd.xlane.f32.xlu2 %v1969_v13  ;;  %v805_v7 = vadd.f32 %v804_v10, %v803_v9 }
0x145b   : > { %v1971_v14 = vpop.xlane.xlu2 %1970 }
0x145c   : > { %v1972_v15 = vmul.f32 %v1971_v14, %v3091_v58 }
0x145e   : > { %v1973_v16 = vadd.f32 1e-05, %v1972_v15 }
0x1460   : > { %2477 = vrsqrt.f32 %v1973_v16  ;;  %vm1980_vm10 = vweird.f32 %v1973_v16 }
0x1466   : > { %v2478_v17 = vpop.eup %2477 }
0x1467   : > { %v1975_v18 = vmul.f32 %v2478_v17, %v1973_v16  ;;  %vm1981_vm9 = vweird.f32 %v2478_v17 }
0x1468   : > { %vm1982_vm11 = vmor %vm1980_vm10, %vm1981_vm9 }
0x1469   : > { %v1976_v19 = vmul.f32 %v2478_v17, %v1975_v18 }
0x146b   : > { %v1977_v20 = vmul.f32 0.5, %v1976_v19 }
0x146d   : > { %v1978_v21 = vsub.f32 1.5, %v1977_v20 }
0x146f   : > { %v1979_v22 = vmul.f32 %v2478_v17, %v1978_v21 }
0x1471   : > { %v1983_v24 = vsel %vm1982_vm11, %v2478_v17, %v1979_v22 }
0x1472   : > { %v1984_v25 = vmul.f32 %v1983_v24, %v1967_v11  ;;  %v806_v11 = vrot.slane %v805_v7, 2 }
0x1474   : > { %v1988_v27 = vmul.f32 %v2425_v23, %v1984_v25  ;;  %v807_v12 = vadd.f32 %v806_v11, %v805_v7 }
0x1476   : > { %v1992_v4 = vadd.f32 %v2426_v26, %v1988_v27  ;;  %v808_v13 = vrot.slane %v807_v12, 1  ;;  %v2030_v26 = vpop.permute.xlu1 %2029 }
0x1478   : > { %v1995_v28 = vsel %vm1292_vm12, %v1992_v4, 0.0  ;;  %v809_v14 = vadd.f32 %v808_v13, %v807_v12 }
0x1479   : > { %1996 = vadd.xlane.f32.xlu2 %v1995_v28 }
0x147a   : > { %v810_v15 = vmul.f32 %v809_v14, %v2997_v8 }
0x147c   : > { %v811_v16 = vadd.f32 1e-05, %v810_v15 }
0x147e   : > { %v822_v24 = vand.u32 2147483648, %v811_v16  ;;  %vm821_vm0 = vcmp.eq.f32.partialorder %v811_v16, 0.0 }
0x14ec   : > { %v1997_v29 = vpop.xlane.xlu2 %1996 }
0x14ed   : > { %v1998_v30 = vmul.f32 %v1997_v29, %v3091_v58 }
0x14ef   : > { %v1999_v31 = vsub.f32 %v1992_v4, %v1998_v30 }
0x14f1   : > { %v2000_v32 = vmul.f32 %v1999_v31, %v1999_v31 }
0x14f3   : > { %v2001_v33 = vsel %vm1292_vm12, %v2000_v32, 0.0 }
0x14f4   : > { %2002 = vadd.xlane.f32.xlu0 %v2001_v33 }
0x1567   : > { %v2003_v34 = vpop.xlane.xlu0 %2002 }
0x1568   : > { %v2004_v37 = vmul.f32 %v2003_v34, %v3091_v58 }
0x156a   : > { %v2005_v40 = vadd.f32 1e-05, %v2004_v37 }
0x156c   : > { %2479 = vrsqrt.f32 %v2005_v40  ;;  %vm2012_vm13 = vweird.f32 %v2005_v40 }
0x156d   : > { %2481 = vrsqrt.f32 %v811_v16 }
0x1572   : > { %v2480_v39 = vpop.eup %2479 }
0x1573   : > { %v2007_v41 = vmul.f32 %v2480_v39, %v2005_v40  ;;  %vm2013_vm12 = vweird.f32 %v2480_v39  ;;  %v2482_v17 = vpop.eup %2481 }
0x1574   : > { %vm2014_vm14 = vmor %vm2012_vm13, %vm2013_vm12  ;;  %v813_v18 = vmul.f32 %v2482_v17, %v811_v16 }
0x1575   : > { %v2008_v42 = vmul.f32 %v2480_v39, %v2007_v41 }
0x1576   : > { %v814_v19 = vmul.f32 %v2482_v17, %v813_v18 }
0x1577   : > { %v2009_v43 = vmul.f32 0.5, %v2008_v42 }
0x1578   : > { %v815_v20 = vmul.f32 0.5, %v814_v19 }
0x1579   : > { %v2010_v44 = vsub.f32 1.5, %v2009_v43 }
0x157a   : > { %v816_v21 = vsub.f32 1.5, %v815_v20 }
0x157b   : > { %v2011_v45 = vmul.f32 %v2480_v39, %v2010_v44 }
0x157c   : > { %v817_v22 = vmul.f32 %v2482_v17, %v816_v21 }
0x157d   : > { %v2015_v58 = vsel %vm2014_vm14, %v2480_v39, %v2011_v45 }
0x157e   : > { %v2016_v47 = vmul.f32 %v2015_v58, %v1999_v31  ;;  %v818_v23 = vmul.f32 %v817_v22, %v811_v16 }
0x1580   : > { %v2020_v49 = vmul.f32 %v2427_v46, %v2016_v47 }
0x1582   : > { %v2024_v50 = vadd.f32 %v2428_v48, %v2020_v49 }
0x1584   : > { %2298 = vmatpush.xpose.msk.msra.mxu3 %vm896_vm7, %v2024_v50 }
0x1587   : > { %2299 = vmatmul.msk.f32.vlgmr.msra.gmra.mxu3 %vm896_vm7, %v2025_v51  ;;  %vm819_vm7 = vcmp.eq.f32.partialorder %v811_v16, inf }
0x1588   : > { %v820_v25 = vsel %vm819_vm7, %v811_v16, %v818_v23 }
0x1589   : > { %v823_v4 = vsel %vm821_vm0, %v822_v24, %v820_v25 }
0x160a   : > { %v2055_v27 = vpop.f32.mrf.mxu3 }
0x160b   : > { %v2056_v28 = vadd.f32 %v2055_v27, %v2030_v26 }
0x160d   : > { %v2058_v29 = vmul.f32 %v2056_v28, %v823_v4 }
0x160f   : > { %v2059_v8 = vadd.f32 %v2058_v29, %v796_v63 }
0x1611   : > { %2060 = vst.msk [vmem:[%s775_s29] sm:$0xff] %vm779_vm15, %v2059_v8 }
0x1612 PF: > { %s3366_s12 = sld [smem:[#allocation20_spill]] }
0x1618   : > { %s35_s1 = sadd.s32 1, %s3366_s12  }
0x1619   : > { %p32_p7 = scmp.ge.s32.totalorder %s35_s1, 4  }
0x161b   :  { %34 = sbr.rel (!%p32_p7) target bundleno = 14 (0xe), region = 178 }
0x1620   :  { %2080 = vsyncpa [#allocation3], 1 }
0x1621   :  { %2082 = vsyncpa [#allocation3 + $0x1], 1 }
0x1622   :  { %2083 = vsyncpa [#allocation5], 1 }
0x1623   :  { %2084 = vsyncpa [#allocation8], 1 }
0x1624   :  { %2085 = vsyncpa [#allocation11], 1 }
0x1625   :  { %2086 = vsyncpa [#allocation14], 1 }

</bundles_post_ra>
